<compile_context>
chip_gen: v7x
topology: tpu7x:2x2x1
jax: 0.10.0
libtpu: 0.0.40
codegen_flags: <defaults>
</compile_context>

<pallas_src>
import jax
import jax.numpy as jnp
from jax.experimental import pallas as pl
from jax.experimental.pallas import tpu as pltpu

H1 = 400
H2 = 300
H1_PAD = 512   # 400 -> next multiple of 128
H2_PAD = 384   # 300 -> next multiple of 128
TB_MAX = 512   # largest batch tile (fills the 256-row MXU twice, small VMEM)


def _round_up(n, m):
    return ((n + m - 1) // m) * m


def _cdiv(a, b):
    return (a + b - 1) // b


def _choose_tiling(batch):
    """Pick (TB, n_tiles, B_pad): big tiles, >=2 and even grid steps (v7x)."""
    n_tiles = max(2, _cdiv(batch, TB_MAX))
    n_tiles = _round_up(n_tiles, 2)          # even -> balanced across 2 TCs
    tb = _round_up(_cdiv(batch, n_tiles), 8)  # sublane multiple
    return tb, n_tiles, tb * n_tiles


# ----------------------------------------------------------------------------
# Kernel
# ----------------------------------------------------------------------------
def _critic_kernel(xu_ref, w1_ref, b1_ref, w2_ref, b2_ref, w3_ref, b3_ref,
                   out_ref):
    # Layer 1: relu([x;u] @ W1 + b1)   (concat fused in the wrapper; single
    # bf16 MXU push, f32 accumulate)
    h1 = jnp.dot(xu_ref[...], w1_ref[...], preferred_element_type=jnp.float32)
    h1 = jnp.maximum(h1 + b1_ref[...], 0.0)

    # Layer 2: relu(h1 @ W2 + b2)   (bf16 operands, f32 accumulate)
    h2 = jnp.dot(h1.astype(jnp.bfloat16), w2_ref[...],
                 preferred_element_type=jnp.float32)
    h2 = jnp.maximum(h2 + b2_ref[...], 0.0)

    # Layer 3 (out_features = 1): cross-lane reduction instead of an N=1 MXU
    # matmul -> keeps the MXU free.
    q = jnp.sum(h2 * w3_ref[...], axis=-1, keepdims=True) + b3_ref[...]
    out_ref[...] = q.astype(out_ref.dtype)


# ----------------------------------------------------------------------------
# Wrapper
# ----------------------------------------------------------------------------
def critic_forward(x, u, prepared):
    """Pallas forward of Critic.

    x: (B, state_dim) f32, u: (B, action_dim) f32
    prepared: dict from prepare_critic_params()
    returns: (B, 1) f32
    """
    B = x.shape[0]
    d_in = x.shape[1] + u.shape[1]
    k_pad = prepared["w1"].shape[0]

    TB, n_tiles, B_pad = _choose_tiling(B)

    # Pack [x || u] once in the wrapper as bf16; zero-pad batch rows and the
    # contraction dim (matching zero rows in W1 -> exact math).
    xu = jnp.concatenate([x, u], axis=1).astype(jnp.bfloat16)
    xu = jnp.pad(xu, ((0, B_pad - B), (0, k_pad - d_in)))

    out = pl.pallas_call(
        _critic_kernel,
        out_shape=jax.ShapeDtypeStruct((B_pad, 1), jnp.float32),
        grid=(n_tiles,),
        in_specs=[
            # Packed activations: tiled over the batch grid.
            pl.BlockSpec((TB, k_pad), lambda i: (i, 0)),
            # Weights/biases: constant index_map -> DMA'd once, VMEM-resident.
            pl.BlockSpec(prepared["w1"].shape, lambda i: (0, 0)),
            pl.BlockSpec(prepared["b1"].shape, lambda i: (0, 0)),
            pl.BlockSpec(prepared["w2"].shape, lambda i: (0, 0)),
            pl.BlockSpec(prepared["b2"].shape, lambda i: (0, 0)),
            pl.BlockSpec(prepared["w3"].shape, lambda i: (0, 0)),
            pl.BlockSpec(prepared["b3"].shape, lambda i: (0, 0)),
        ],
        out_specs=pl.BlockSpec((TB, 1), lambda i: (i, 0)),
        compiler_params=pltpu.CompilerParams(
            dimension_semantics=("parallel",),
            vmem_limit_bytes=32 * 1024 * 1024),
    )(xu, prepared["w1"], prepared["b1"], prepared["w2"], prepared["b2"],
      prepared["w3"], prepared["b3"])

    return out[:B]


# ----------------------------------------------------------------------------
# Params: canonical (PyTorch-like) init + kernel-layout preparation
# ----------------------------------------------------------------------------
def init_critic_params(key, state_dim, action_dim):
    """nn.Linear-style init: U[-1/sqrt(fan_in), 1/sqrt(fan_in)]; weights stored
    transposed (in_features, out_features), biases as (1, out_features)."""
    d_in = state_dim + action_dim
    keys = jax.random.split(key, 6)

    def lin(kw, kb, fan_in, fan_out):
        bound = 1.0 / jnp.sqrt(jnp.float32(fan_in))
        w = jax.random.uniform(kw, (fan_in, fan_out), jnp.float32, -bound, bound)
        b = jax.random.uniform(kb, (1, fan_out), jnp.float32, -bound, bound)
        return w, b

    w1, b1 = lin(keys[0], keys[1], d_in, H1)
    w2, b2 = lin(keys[2], keys[3], H1, H2)
    w3, b3 = lin(keys[4], keys[5], H2, 1)
    return {"w1": w1, "b1": b1, "w2": w2, "b2": b2, "w3": w3, "b3": b3}


def prepare_critic_params(params):
    """Zero-pad the contraction/hidden dims to clean tiles and cast the two
    big matmul weights to bf16. Padded rows/cols are exact zeros, so the math
    is unchanged through ReLU."""
    f32 = jnp.float32
    d_in = params["w1"].shape[0]
    k_pad = _round_up(d_in, 8)

    w1_pad = jnp.zeros((k_pad, H1_PAD), f32).at[:d_in, :H1].set(params["w1"])
    b1_pad = jnp.zeros((1, H1_PAD), f32).at[:, :H1].set(params["b1"])
    w2_pad = jnp.zeros((H1_PAD, H2_PAD), f32).at[:H1, :H2].set(params["w2"])
    b2_pad = jnp.zeros((1, H2_PAD), f32).at[:, :H2].set(params["b2"])
    w3_row = jnp.zeros((1, H2_PAD), f32).at[0, :H2].set(params["w3"][:, 0])

    return {
        "w1": w1_pad.astype(jnp.bfloat16),   # (k_pad, 512) single fused W1
        "b1": b1_pad,                        # (1, 512) f32
        "w2": w2_pad.astype(jnp.bfloat16),   # (512, 384)
        "b2": b2_pad,                        # (1, 384) f32
        "w3": w3_row,                        # (1, 384) f32 for the VPU reduce
        "b3": params["b3"],                  # (1, 1) f32
    }


# ----------------------------------------------------------------------------
# References
# ----------------------------------------------------------------------------
def _kernel_math_reference(x, u, prepared):
    """Pure-JAX mirror of the kernel's bf16/f32 math (for tight checking)."""
    d_in = x.shape[1] + u.shape[1]
    xu = jnp.concatenate([x, u], axis=1).astype(jnp.bfloat16)
    h1 = jnp.dot(xu, prepared["w1"][:d_in], preferred_element_type=jnp.float32)
    h1 = jnp.maximum(h1 + prepared["b1"], 0.0)
    h2 = jnp.dot(h1.astype(jnp.bfloat16), prepared["w2"],
                 preferred_element_type=jnp.float32)
    h2 = jnp.maximum(h2 + prepared["b2"], 0.0)
    return jnp.sum(h2 * prepared["w3"], axis=-1, keepdims=True) + prepared["b3"]


def _module_reference(x, u, params):
    """Original PyTorch-module semantics in plain f32 JAX."""
    xu = jnp.concatenate([x, u], axis=1)
    h1 = jnp.maximum(xu @ params["w1"] + params["b1"], 0.0)
    h2 = jnp.maximum(h1 @ params["w2"] + params["b2"], 0.0)
    return h2 @ params["w3"] + params["b3"]


# ----------------------------------------------------------------------------
if __name__ == "__main__":
    key = jax.random.PRNGKey(0)
    k_x, k_u, k_p, k_x2, k_u2 = jax.random.split(key, 5)

    state_dim = 16
    action_dim = 8

    params = init_critic_params(k_p, state_dim, action_dim)
    prepared = prepare_critic_params(params)

    # Case 1: batch large enough to exercise the batch grid (2 parallel tiles).
    batch = 256
    x = jax.random.normal(k_x, (batch, state_dim), jnp.float32)
    u = jax.random.normal(k_u, (batch, action_dim), jnp.float32)
    q = jax.block_until_ready(critic_forward(x, u, prepared))
    assert q.shape == (batch, 1)
    assert jnp.allclose(q, _kernel_math_reference(x, u, prepared), atol=2e-3, rtol=2e-3)
    assert jnp.allclose(q, _module_reference(x, u, params), atol=5e-2, rtol=5e-2)

    # Case 2: tiny batch (two tiny tiles, batch padded to sublane multiples).
    batch2 = 8
    x2 = jax.random.normal(k_x2, (batch2, state_dim), jnp.float32)
    u2 = jax.random.normal(k_u2, (batch2, action_dim), jnp.float32)
    q2 = jax.block_until_ready(critic_forward(x2, u2, prepared))
    assert q2.shape == (batch2, 1)
    assert jnp.allclose(q2, _kernel_math_reference(x2, u2, prepared), atol=2e-3, rtol=2e-3)
    assert jnp.allclose(q2, _module_reference(x2, u2, params), atol=5e-2, rtol=5e-2)

    print("KERNEL_OK")
</pallas_src>

<mosaic_0001>
module attributes {stable_mosaic.version = 11 : i64} {
  func.func @_critic_kernel(%arg0: i32, %arg1: memref<128x24xbf16, #tpu.memory_space<vmem>>, %arg2: memref<24x512xbf16, #tpu.memory_space<vmem>>, %arg3: memref<1x512xf32, #tpu.memory_space<vmem>>, %arg4: memref<512x384xbf16, #tpu.memory_space<vmem>>, %arg5: memref<1x384xf32, #tpu.memory_space<vmem>>, %arg6: memref<1x384xf32, #tpu.memory_space<vmem>>, %arg7: memref<1x1xf32, #tpu.memory_space<vmem>>, %arg8: memref<128x1xf32, #tpu.memory_space<vmem>>) attributes {dimension_semantics = [#tpu.dimension_semantics<parallel>], iteration_bounds = array<i64: 2>, scalar_prefetch = 0 : i64, scratch_operands = 0 : i64, tpu.core_type = #tpu.core_type<tc>, window_params = [{transform_indices = @transform_0, window_bounds = array<i64: 128, 24>}, {pipeline_mode = #tpu.pipeline_mode<synchronous>, transform_indices = @transform_1, window_bounds = array<i64: 24, 512>}, {pipeline_mode = #tpu.pipeline_mode<synchronous>, transform_indices = @transform_2, window_bounds = array<i64: 1, 512>}, {pipeline_mode = #tpu.pipeline_mode<synchronous>, transform_indices = @transform_3, window_bounds = array<i64: 512, 384>}, {pipeline_mode = #tpu.pipeline_mode<synchronous>, transform_indices = @transform_4, window_bounds = array<i64: 1, 384>}, {pipeline_mode = #tpu.pipeline_mode<synchronous>, transform_indices = @transform_5, window_bounds = array<i64: 1, 384>}, {pipeline_mode = #tpu.pipeline_mode<synchronous>, transform_indices = @transform_6, window_bounds = array<i64: 1, 1>}, {transform_indices = @transform_7, window_bounds = array<i64: 128, 1>}]} {
    %c0 = arith.constant 0 : index
    %c0_0 = arith.constant 0 : index
    %0 = vector.load %arg1[%c0, %c0_0] : memref<128x24xbf16, #tpu.memory_space<vmem>>, vector<128x24xbf16>
    %c0_1 = arith.constant 0 : index
    %c0_2 = arith.constant 0 : index
    %1 = vector.load %arg2[%c0_1, %c0_2] : memref<24x512xbf16, #tpu.memory_space<vmem>>, vector<24x512xbf16>
    %cst = arith.constant dense<0.000000e+00> : vector<128x512xf32>
    %2 = tpu.matmul %0, %1, %cst {dimension_numbers = #tpu.dot_dimension_numbers<[1], [0], [0], [1], [0, 0, 1, 1], [], []>} : vector<128x24xbf16>, vector<24x512xbf16>, vector<128x512xf32> -> vector<128x512xf32>
    %c0_3 = arith.constant 0 : index
    %c0_4 = arith.constant 0 : index
    %3 = vector.load %arg3[%c0_3, %c0_4] : memref<1x512xf32, #tpu.memory_space<vmem>>, vector<1x512xf32>
    %4 = vector.broadcast %3 : vector<1x512xf32> to vector<128x512xf32>
    %5 = arith.addf %2, %4 : vector<128x512xf32>
    %cst_5 = arith.constant 0.000000e+00 : f32
    %6 = vector.broadcast %cst_5 : f32 to vector<128x512xf32>
    %7 = arith.maximumf %5, %6 : vector<128x512xf32>
    %8 = arith.truncf %7 : vector<128x512xf32> to vector<128x512xbf16>
    %c0_6 = arith.constant 0 : index
    %c0_7 = arith.constant 0 : index
    %9 = vector.load %arg4[%c0_6, %c0_7] : memref<512x384xbf16, #tpu.memory_space<vmem>>, vector<512x384xbf16>
    %cst_8 = arith.constant dense<0.000000e+00> : vector<128x384xf32>
    %10 = tpu.matmul %8, %9, %cst_8 {dimension_numbers = #tpu.dot_dimension_numbers<[1], [0], [0], [1], [0, 0, 1, 1], [], []>} : vector<128x512xbf16>, vector<512x384xbf16>, vector<128x384xf32> -> vector<128x384xf32>
    %c0_9 = arith.constant 0 : index
    %c0_10 = arith.constant 0 : index
    %11 = vector.load %arg5[%c0_9, %c0_10] : memref<1x384xf32, #tpu.memory_space<vmem>>, vector<1x384xf32>
    %12 = vector.broadcast %11 : vector<1x384xf32> to vector<128x384xf32>
    %13 = arith.addf %10, %12 : vector<128x384xf32>
    %cst_11 = arith.constant 0.000000e+00 : f32
    %14 = vector.broadcast %cst_11 : f32 to vector<128x384xf32>
    %15 = arith.maximumf %13, %14 : vector<128x384xf32>
    %c0_12 = arith.constant 0 : index
    %c0_13 = arith.constant 0 : index
    %16 = vector.load %arg6[%c0_12, %c0_13] : memref<1x384xf32, #tpu.memory_space<vmem>>, vector<1x384xf32>
    %17 = vector.broadcast %16 : vector<1x384xf32> to vector<128x384xf32>
    %18 = arith.mulf %15, %17 : vector<128x384xf32>
    %cst_14 = arith.constant dense<0.000000e+00> : vector<128xf32>
    %19 = vector.multi_reduction <add>, %18, %cst_14 [1] : vector<128x384xf32> to vector<128xf32>
    %20 = vector.shape_cast %19 : vector<128xf32> to vector<128x1xf32>
    %c0_15 = arith.constant 0 : index
    %c0_16 = arith.constant 0 : index
    %21 = vector.load %arg7[%c0_15, %c0_16] : memref<1x1xf32, #tpu.memory_space<vmem>>, vector<1x1xf32>
    %22 = vector.broadcast %21 : vector<1x1xf32> to vector<128x1xf32>
    %23 = arith.addf %20, %22 : vector<128x1xf32>
    %c0_17 = arith.constant 0 : index
    %c0_18 = arith.constant 0 : index
    %24 = vector.load %arg8[%c0_17, %c0_18] : memref<128x1xf32, #tpu.memory_space<vmem>>, vector<128x1xf32>
    tpu.vector_store %arg8[%c0_17, %c0_18], %23 {strides = array<i32>} : memref<128x1xf32, #tpu.memory_space<vmem>>, vector<128x1xf32>,
    return
  }
  func.func @transform_0(%arg0: i32) -> (i32, i32) {
    %c0_i32 = arith.constant 0 : i32
    %c0_i32_0 = arith.constant 0 : i32
    return %arg0, %c0_i32 : i32, i32
  }
  func.func @transform_1(%arg0: i32) -> (i32, i32) {
    %c0_i32 = arith.constant 0 : i32
    %c0_i32_0 = arith.constant 0 : i32
    %c0_i32_1 = arith.constant 0 : i32
    return %c0_i32, %c0_i32_0 : i32, i32
  }
  func.func @transform_2(%arg0: i32) -> (i32, i32) {
    %c0_i32 = arith.constant 0 : i32
    %c0_i32_0 = arith.constant 0 : i32
    %c0_i32_1 = arith.constant 0 : i32
    return %c0_i32, %c0_i32_0 : i32, i32
  }
  func.func @transform_3(%arg0: i32) -> (i32, i32) {
    %c0_i32 = arith.constant 0 : i32
    %c0_i32_0 = arith.constant 0 : i32
    %c0_i32_1 = arith.constant 0 : i32
    return %c0_i32, %c0_i32_0 : i32, i32
  }
  func.func @transform_4(%arg0: i32) -> (i32, i32) {
    %c0_i32 = arith.constant 0 : i32
    %c0_i32_0 = arith.constant 0 : i32
    %c0_i32_1 = arith.constant 0 : i32
    return %c0_i32, %c0_i32_0 : i32, i32
  }
  func.func @transform_5(%arg0: i32) -> (i32, i32) {
    %c0_i32 = arith.constant 0 : i32
    %c0_i32_0 = arith.constant 0 : i32
    %c0_i32_1 = arith.constant 0 : i32
    return %c0_i32, %c0_i32_0 : i32, i32
  }
  func.func @transform_6(%arg0: i32) -> (i32, i32) {
    %c0_i32 = arith.constant 0 : i32
    %c0_i32_0 = arith.constant 0 : i32
    %c0_i32_1 = arith.constant 0 : i32
    return %c0_i32, %c0_i32_0 : i32, i32
  }
  func.func @transform_7(%arg0: i32) -> (i32, i32) {
    %c0_i32 = arith.constant 0 : i32
    %c0_i32_0 = arith.constant 0 : i32
    return %arg0, %c0_i32 : i32, i32
  }
}

</mosaic_0001>

<bundles_post_ra>
// kernel: tpu_custom_call.1
= control target key start
LH: loop header
LB: loop body
LE: loop exit
PB: predicated region body
PF: predicated region fallthrough
CT: control target
= control target key end

     0   :  { %s3182_s0 = inlined_call_operand.vmem [shape: bf16[256,24], index: 0, kind: input, shape index: {}]   ;;  %s3183_s1 = inlined_call_operand.vmem [shape: bf16[24,512], index: 1, kind: input, shape index: {}]   ;;  %s3184_s2 = inlined_call_operand.vmem [shape: f32[1,512], index: 2, kind: input, shape index: {}]   ;;  %s3185_s3 = inlined_call_operand.hbm [shape: bf16[512,384], index: 3, kind: input, shape index: {}]   ;;  %s3186_s4 = inlined_call_operand.vmem [shape: f32[1,384], index: 4, kind: input, shape index: {}]   ;;  %s3187_s5 = inlined_call_operand.vmem [shape: f32[1,384], index: 5, kind: input, shape index: {}]   ;;  %s3188_s6 = inlined_call_operand.<no memory space> [shape: f32[1,1], index: 6, kind: input, shape index: {}]   ;;  %s3189_s7 = inlined_call_operand.vmem [shape: f32[256,1], index: 7, kind: output, shape index: {}]  }
   0x1   :  { %v12_v0 = vstv %s3188_s6 }
   0x2   :  { %13 = vst [vmem:[#allocation2] sm:$0x1] %v12_v0 }
   0x3   :  { %14 = vsyncpa [#allocation4], 0  ;;  %s2727_s26 = smov 0  }
   0x4 LB: > { %s2136_s27 = sadd.s32 4294967295, %s2678_s26   ;;  %p2138_p0 = scmp.ge.s32.totalorder %s2678_s26, 1  ;;  %s2678_s26 = sphi %s2727_s26, %s20_s26  }
   0x5   : > { %p203_p1 = scmp.lt.s32.totalorder %s2678_s26, 3  ;;  %s2680_s28 = smov [#allocation3]  }
   0x6   : > { %s221_s29 = sshll.u32 %s2680_s28, 4  ;;  %p2741_p3 = scmp.eq.s32.totalorder %s2136_s27, 0  ;;  %s222_s29 = int_to_ptr.vmem [resolvable:$true] %s221_s29 }
   0x7   : > { %p2735_p2 = pnand %p2138_p0, %p203_p1  ;;  %s2640_s11 = scalar_lea.hbm %s3185_s3, 12288 }
   0x8   : > { %s3194_s30 = scalar_select %p2741_p3, 1, 0 }
   0x9   : > { %s3193_s6 = scalar_select %p2735_p2, 1, 0 }
   0xa   : > { %p2476_p4 = pneg %p2735_p2  ;;  %p2641_p6 = scmp.ne.s32.totalorder %s3185_s3, %s2640_s11 }
   0xb   : > { %p2647_p10 = scmp.lt.u32.totalorder %s2640_s11, %s3185_s3 }
   0xc   : > { %p2749_p5 = pnand %p2741_p3, %p2476_p4 }
   0xe   : > { %p2642_p7 = pneg %p2749_p5 }
  0x10   : > { %p2643_p8 = pnand %p2642_p7, %p2641_p6 }
  0x12   : > { %p2644_p9 = pneg %p2643_p8 }
  0x14   : > { %p2649_p11 = pnand %p2647_p10, %p2644_p9 }
  0x16   : > { %2652 = shalt.err (!%p2649_p11)
}
  0x17   : > { %s2653_s16 = scalar_lea.vmem %s222_s29, 12288  ;;  %p2661_p1 = scmp.lt.s32.totalorder %s222_s29, %s222_s29 }
  0x18   : > { %p2654_p12 = scmp.ne.s32.totalorder %s222_s29, %s2653_s16  ;;  %p2662_p4 = scmp.lt.s32.totalorder %s2653_s16, %s2653_s16 }
  0x1a   : > { %p2656_p13 = pnand %p2654_p12, %p2642_p7  ;;  %p2663_p3 = por %p2662_p4, %p2661_p1 }
  0x1c   : > { %p2657_p0 = pneg %p2656_p13 }
  0x1e   : > { %p2664_p2 = pnand %p2663_p3, %p2657_p0 }
  0x20   : > { %2667 = shalt.err (!%p2664_p2)
}
  0x21   : > { %s2681_s17 = smov 192   ;;  %s2682_s18 = smov 12  }
  0x22   : > { %2479 = dma.hbm_to_vmem [thread:$0]  (!%p2749_p5), %s3185_s3, 12288, %s222_s29, [#allocation4], %s2681_s17, %s2681_s17, %s2682_s18  }
  0x23   : > { %p3196_p6 = scmp.ne.s32.totalorder %s3193_s6, 0 }
  0x24   : > { %p3197_p8 = scmp.ne.s32.totalorder (!%p3196_p6), %s3194_s30, 0 }
  0x25   : > { %255 = sbr.rel (%p3196_p6) target bundleno = 767 (0x2ff), region = 48 }
  0x2c   : > { %2673 = dma.done.wait (%p3197_p8), [#allocation4], 12288  }
  0x2d   : > { %2675 = vsyncadd (%p3197_p8), [#allocation4], 4294955008  ;;  %s2143_s21 = sshll.u32 %s2136_s27, 4  ;;  %v2683_v1 = vmov 0   ;;  %v2494_v2 = vld [vmem:[%s3183_s1 + $0x4] ss:$16 sps:$4 sm:$0xff]  }
  0x2e   : > { %484 = vmatprep.mubr.bf16.mxu0 %v2683_v1  ;;  %p288_p2 = scmp.lt.s32.totalorder %s2143_s21, 31  ;;  %597 = vmatprep.mubr.bf16.mxu1 %v2683_v1  ;;  %v2496_v3 = vld [vmem:[%s3183_s1] ss:$16 sps:$4 sm:$0xff]   ;;  %vm439_vm0 = vcmask 1043456   ;;  %vm414_vm1 = vcmask 195584   ;;  %v321_v11 = vld [vmem:[%s3183_s1 + $0x28] sm:$0xff] }
  0x2f   : > { %v320_v4 = vld [vmem:[%s3183_s1 + $0x20] sm:$0xff]  ;;  %452 = vmatprep.subr.bf16.mxu0 %v2494_v2  ;;  %v2506_v9 = vld [vmem:[%s3183_s1 + $0xc] ss:$16 sps:$4 sm:$0xff]   ;;  %v2508_v10 = vld [vmem:[%s3183_s1 + $0x8] ss:$16 sps:$4 sm:$0xff]   ;;  %v2162_v12 = vcombine.high %v321_v11, %v321_v11  ;;  %v2161_v13 = vcombine.low %v321_v11, %v321_v11  ;;  %vm2051_vm2 = vcmask 7168  }
  0x30   : > { %s3199_s21 = smov (!%p288_p2, %s2143_s21), 31  ;;  %v2160_v5 = vcombine.high %v320_v4, %v320_v4  ;;  %v2159_v6 = vcombine.low %v320_v4, %v320_v4  ;;  %453 = vmatpush1.bf16.msra.mxu0 %v2496_v3  ;;  %565 = vmatprep.subr.bf16.mxu1 %v2506_v9  ;;  %v2512_v14 = vld [vmem:[#allocation3] ss:$12 sps:$4 sm:$0xff]   ;;  %v2514_v15 = vld [vmem:[#allocation3 + $0x4] ss:$12 sps:$4 sm:$0xff]  }
  0x31   : > { %s2144_s22 = sshll.u32 %s3199_s21, 2  ;;  %566 = vmatpush1.bf16.msra.mxu1 %v2508_v10  ;;  %v2515_v16 = vld [vmem:[#allocation3 + $0xc8] ss:$12 sps:$4 sm:$0xff]   ;;  %v447_v18 = vsel %vm439_vm0, %v2161_v13, 0  ;;  %v2517_v21 = vld [vmem:[#allocation3 + $0x18] ss:$12 sps:$4 sm:$0xff]  }
  0x32   : > { %s2788_s29 = scalar_lea.vmem %s3182_s0, %s2144_s22  ;;  %2163 = vmatprep.subr.msk.bf16.mxu0 %vm439_vm0, %v2160_v5  ;;  %v441_v7 = vsel %vm439_vm0, %v2159_v6, 0  ;;  %2172 = vmatprep.subr.msk.bf16.mxu1 %vm439_vm0, %v2162_v12  ;;  %v2516_v19 = vld [vmem:[#allocation3 + $0x8] ss:$12 sps:$4 sm:$0xff]   ;;  %v2523_v23 = vld [vmem:[#allocation3 + $0xe0] ss:$12 sps:$4 sm:$0xff]   ;;  %s2146_s22 = sshll.u32 %s3199_s21, 3 }
  0x33   : > { %v2499_v8 = vld [vmem:[%s2788_s29] sm:$0xff]   ;;  %v2500_v17 = vld [vmem:[%s2788_s29 + $0x8] sm:$0xff]   ;;  %v2501_v24 = vld [vmem:[%s2788_s29 + $0x10] sm:$0xff]   ;;  %s3145_s25 = scalar_lea.vmem %s3189_s7, %s2146_s22 }
  0x34   : > { %455 = vmatpush1.bf16.msra.mxu0 %v441_v7  ;;  %v2519_v20 = vld [vmem:[#allocation3 + $0x1c] ss:$12 sps:$4 sm:$0xff]   ;;  %v2522_v22 = vld [vmem:[#allocation3 + $0x34] ss:$12 sps:$4 sm:$0xff]   ;;  %v2527_v27 = vld [vmem:[#allocation3 + $0x4c] ss:$12 sps:$4 sm:$0xff]  }
  0x35   : > { %1431 = vmatprep.subr.bf16.mxu0 %v2514_v15  ;;  %568 = vmatpush1.bf16.msra.mxu1 %v447_v18  ;;  %v2524_v25 = vld [vmem:[#allocation3 + $0x20] ss:$12 sps:$4 sm:$0xff]   ;;  %v2520_v26 = vld [vmem:[#allocation3 + $0x30] ss:$12 sps:$4 sm:$0xff]   ;;  %v2531_v28 = vld [vmem:[#allocation3 + $0xf8] ss:$12 sps:$4 sm:$0xff]  }
  0x36   : > { %2280 = vmatprep.subr.bf16.mxu1 %v2515_v16  ;;  %v2532_v29 = vld [vmem:[#allocation3 + $0x38] ss:$12 sps:$4 sm:$0xff]   ;;  %v2525_v30 = vld [vmem:[#allocation3 + $0x48] ss:$12 sps:$4 sm:$0xff]   ;;  %v2539_v32 = vld [vmem:[#allocation3 + $0x110] ss:$12 sps:$4 sm:$0xff]  }
  0x37   : > { %2164 = vmatmul.mubr.msk.bf16.vlgmr.msra.gmra.mrb[0].mxu0 %vm414_vm1, %v2499_v8  ;;  %v2530_v31 = vld [vmem:[#allocation3 + $0x64] ss:$12 sps:$4 sm:$0xff]   ;;  %v2502_v34 = vld [vmem:[%s2788_s29 + $0x18] sm:$0xff]   ;;  %v2528_v35 = vld [vmem:[#allocation3 + $0x60] ss:$12 sps:$4 sm:$0xff]  }
  0x38   : > { %494 = vmatprep.mubr.bf16.mxu0 %v2683_v1  ;;  %1432 = vmatpush1.bf16.msra.mxu0 %v2512_v14  ;;  %v2540_v33 = vld [vmem:[#allocation3 + $0x50] ss:$12 sps:$4 sm:$0xff]   ;;  %v2533_v37 = vld [vmem:[#allocation3 + $0x78] ss:$12 sps:$4 sm:$0xff]   ;;  %v2547_v38 = vld [vmem:[#allocation3 + $0x128] ss:$12 sps:$4 sm:$0xff]  }
  0x39   : > { %1433 = vmatprep.subr.bf16.mxu0 %v2519_v20  ;;  %2173 = vmatmul.mubr.msk.bf16.vlgmr.msra.gmra.mrb[0].mxu1 %vm414_vm1, %v2499_v8  ;;  %v2535_v36 = vld [vmem:[#allocation3 + $0x7c] ss:$12 sps:$4 sm:$0xff]   ;;  %v2538_v40 = vld [vmem:[#allocation3 + $0x94] ss:$12 sps:$4 sm:$0xff]   ;;  %v2543_v45 = vld [vmem:[#allocation3 + $0xac] ss:$12 sps:$4 sm:$0xff]  }
  0x3a   : > { %607 = vmatprep.mubr.bf16.mxu1 %v2683_v1  ;;  %2281 = vmatpush3.bf16.msra.mxu1 %v2516_v19  ;;  %v2548_v39 = vld [vmem:[#allocation3 + $0x68] ss:$12 sps:$4 sm:$0xff]   ;;  %v2536_v41 = vld [vmem:[#allocation3 + $0x90] ss:$12 sps:$4 sm:$0xff]   ;;  %v2555_v43 = vld [vmem:[#allocation3 + $0x140] ss:$12 sps:$4 sm:$0xff]  }
  0x3b   : > { %2282 = vmatprep.subr.bf16.mxu1 %v2523_v23  ;;  %v2503_v42 = vld [vmem:[%s2788_s29 + $0x20] sm:$0xff]   ;;  %v2541_v46 = vld [vmem:[#allocation3 + $0xa8] ss:$12 sps:$4 sm:$0xff]   ;;  %v2559_v57 = vld [vmem:[#allocation3 + $0x10c] ss:$12 sps:$4 sm:$0xff]  }
  0x3c   : > { %1434 = vmatpush1.bf16.msra.mxu0 %v2517_v21  ;;  %v2556_v44 = vld [vmem:[#allocation3 + $0x80] ss:$12 sps:$4 sm:$0xff]   ;;  %v2546_v47 = vld [vmem:[#allocation3 + $0xc4] ss:$12 sps:$4 sm:$0xff]   ;;  %v2551_v52 = vld [vmem:[#allocation3 + $0xdc] ss:$12 sps:$4 sm:$0xff]  }
  0x3d   : > { %1435 = vmatprep.subr.bf16.mxu0 %v2522_v22  ;;  %v2563_v48 = vld [vmem:[#allocation3 + $0x158] ss:$12 sps:$4 sm:$0xff]   ;;  %v2544_v50 = vld [vmem:[#allocation3 + $0xc0] ss:$12 sps:$4 sm:$0xff]   ;;  %v2552_v55 = vld [vmem:[#allocation3 + $0xf0] ss:$12 sps:$4 sm:$0xff]  }
  0x3e   : > { %2283 = vmatpush3.bf16.msra.mxu1 %v2524_v25  ;;  %v2564_v49 = vld [vmem:[#allocation3 + $0x98] ss:$12 sps:$4 sm:$0xff]   ;;  %v2554_v54 = vld [vmem:[#allocation3 + $0xf4] ss:$12 sps:$4 sm:$0xff]   ;;  %v2567_v62 = vld [vmem:[#allocation3 + $0x13c] ss:$12 sps:$4 sm:$0xff]  }
  0x3f   : > { %2165 = vmatmul.mubr.msk.bf16.gmra.mrb[4].mxu0 %vm414_vm1, %v2500_v17  ;;  %2284 = vmatprep.subr.bf16.mxu1 %v2531_v28  ;;  %v2504_v51 = vld [vmem:[%s2788_s29 + $0x28] sm:$0xff]   ;;  %v2505_v56 = vld [vmem:[%s2788_s29 + $0x30] sm:$0xff]   ;;  %v2509_v61 = vld [vmem:[%s2788_s29 + $0x38] sm:$0xff]  }
  0x40   : > { %504 = vmatprep.mubr.bf16.mxu0 %v2683_v1  ;;  %1436 = vmatpush1.bf16.msra.mxu0 %v2520_v26  ;;  %v2549_v53 = vld [vmem:[#allocation3 + $0xd8] ss:$12 sps:$4 sm:$0xff]   ;;  %v2557_v58 = vld [vmem:[#allocation3 + $0x108] ss:$12 sps:$4 sm:$0xff]   ;;  %v2560_v60 = vld [vmem:[#allocation3 + $0x120] ss:$12 sps:$4 sm:$0xff]  }
  0x41   : > { %1437 = vmatprep.subr.bf16.mxu0 %v2527_v27  ;;  %2174 = vmatmul.mubr.msk.bf16.gmra.mrb[4].mxu1 %vm414_vm1, %v2500_v17  ;;  %v2562_v59 = vld [vmem:[#allocation3 + $0x124] ss:$12 sps:$4 sm:$0xff]   ;;  %v2570_v0 = vld [vmem:[#allocation3 + $0x154] ss:$12 sps:$4 sm:$0xff]   ;;  %v2575_v4 = vld [vmem:[#allocation3 + $0x16c] ss:$12 sps:$4 sm:$0xff]  }
  0x42   : > { %617 = vmatprep.mubr.bf16.mxu1 %v2683_v1  ;;  %2285 = vmatpush3.bf16.msra.mxu1 %v2532_v29  ;;  %v2565_v63 = vld [vmem:[#allocation3 + $0x138] ss:$12 sps:$4 sm:$0xff]   ;;  %v2568_v2 = vld [vmem:[#allocation3 + $0x150] ss:$12 sps:$4 sm:$0xff]   ;;  %v2573_v6 = vld [vmem:[#allocation3 + $0x168] ss:$12 sps:$4 sm:$0xff]  }
  0x43   : > { %2286 = vmatprep.subr.bf16.mxu1 %v2539_v32  ;;  %v2571_v3 = vld [vmem:[#allocation3 + $0x170] ss:$12 sps:$4 sm:$0xff]   ;;  %v2579_v8 = vld [vmem:[#allocation3 + $0x248] ss:$12 sps:$4 sm:$0xff]  }
  0x44   : > { %1438 = vmatpush1.bf16.msra.mxu0 %v2525_v30  ;;  %v2572_v5 = vld [vmem:[#allocation3 + $0xb0] ss:$12 sps:$4 sm:$0xff]  }
  0x45   : > { %1439 = vmatprep.subr.bf16.mxu0 %v2530_v31  ;;  %v2578_v7 = vld [vmem:[#allocation3 + $0x184] ss:$12 sps:$4 sm:$0xff]   ;;  %v322_v11 = vld [vmem:[%s3184_s2] sm:$0xf] }
  0x46   : > { %2287 = vmatpush3.bf16.msra.mxu1 %v2540_v33 }
  0x47   : > { %2166 = vmatmul.mubr.msk.bf16.gmra.mrb[8].mxu0 %vm414_vm1, %v2501_v24  ;;  %2288 = vmatprep.subr.bf16.mxu1 %v2547_v38  ;;  %v2583_v38 = vld [vmem:[#allocation3 + $0x19c] ss:$12 sps:$4 sm:$0xff]  }
  0x48   : > { %514 = vmatprep.mubr.bf16.mxu0 %v2683_v1  ;;  %1440 = vmatpush1.bf16.msra.mxu0 %v2528_v35  ;;  %v2580_v35 = vld [vmem:[#allocation3 + $0x188] ss:$12 sps:$4 sm:$0xff]  }
  0x49   : > { %1441 = vmatprep.subr.bf16.mxu0 %v2535_v36  ;;  %2175 = vmatmul.mubr.msk.bf16.gmra.mrb[8].mxu1 %vm414_vm1, %v2501_v24 }
  0x4a   : > { %627 = vmatprep.mubr.bf16.mxu1 %v2683_v1  ;;  %2289 = vmatpush3.bf16.msra.mxu1 %v2548_v39  ;;  %v2587_v39 = vld [vmem:[#allocation3 + $0x260] ss:$12 sps:$4 sm:$0xff]  }
  0x4b   : > { %2290 = vmatprep.subr.bf16.mxu1 %v2555_v43 }
  0x4c   : > { %1442 = vmatpush1.bf16.msra.mxu0 %v2533_v37 }
  0x4d   : > { %1443 = vmatprep.subr.bf16.mxu0 %v2538_v40 }
  0x4e   : > { %2291 = vmatpush3.bf16.msra.mxu1 %v2556_v44 }
  0x4f   : > { %2167 = vmatmul.mubr.msk.bf16.gmra.mrb[12].mxu0 %vm414_vm1, %v2502_v34  ;;  %2292 = vmatprep.subr.bf16.mxu1 %v2563_v48 }
  0x50   : > { %524 = vmatprep.mubr.bf16.mxu0 %v2683_v1  ;;  %1444 = vmatpush1.bf16.msra.mxu0 %v2536_v41 }
  0x51   : > { %1445 = vmatprep.subr.bf16.mxu0 %v2543_v45  ;;  %2176 = vmatmul.mubr.msk.bf16.gmra.mrb[12].mxu1 %vm414_vm1, %v2502_v34  ;;  %v2576_v34 = vld [vmem:[#allocation3 + $0x180] ss:$12 sps:$4 sm:$0xff]  }
  0x52   : > { %637 = vmatprep.mubr.bf16.mxu1 %v2683_v1  ;;  %2293 = vmatpush3.bf16.msra.mxu1 %v2564_v49 }
  0x53   : > { %2294 = vmatprep.subr.bf16.mxu1 %v2571_v3 }
  0x54   : > { %1446 = vmatpush1.bf16.msra.mxu0 %v2541_v46 }
  0x55   : > { %1447 = vmatprep.subr.bf16.mxu0 %v2546_v47  ;;  %v2581_v47 = vld [vmem:[#allocation3 + $0x198] ss:$12 sps:$4 sm:$0xff]  }
  0x56   : > { %2295 = vmatpush3.bf16.msra.mxu1 %v2572_v5  ;;  %v2584_v5 = vld [vmem:[#allocation3 + $0x1b0] ss:$12 sps:$4 sm:$0xff]  }
  0x57   : > { %2168 = vmatmul.mubr.msk.bf16.gmra.mrb[16].mxu0 %vm414_vm1, %v2503_v42  ;;  %2344 = vmatprep.subr.bf16.mxu1 %v2579_v8 }
  0x58   : > { %534 = vmatprep.mubr.bf16.mxu0 %v2683_v1  ;;  %1448 = vmatpush1.bf16.msra.mxu0 %v2544_v50 }
  0x59   : > { %1449 = vmatprep.subr.bf16.mxu0 %v2551_v52  ;;  %2177 = vmatmul.mubr.msk.bf16.gmra.mrb[16].mxu1 %vm414_vm1, %v2503_v42  ;;  %v2588_v52 = vld [vmem:[#allocation3 + $0x1a0] ss:$12 sps:$4 sm:$0xff]  }
  0x5a   : > { %647 = vmatprep.mubr.bf16.mxu1 %v2683_v1 }
  0x5c   : > { %1450 = vmatpush1.bf16.msra.mxu0 %v2549_v53 }
  0x5d   : > { %1451 = vmatprep.subr.bf16.mxu0 %v2554_v54 }
  0x5f   : > { %2169 = vmatmul.mubr.msk.bf16.gmra.mrb[20].mxu0 %vm414_vm1, %v2504_v51 }
  0x60   : > { %544 = vmatprep.mubr.bf16.mxu0 %v2683_v1  ;;  %1452 = vmatpush1.bf16.msra.mxu0 %v2552_v55 }
  0x61   : > { %1453 = vmatprep.subr.bf16.mxu0 %v2559_v57  ;;  %2178 = vmatmul.mubr.msk.bf16.gmra.mrb[20].mxu1 %vm414_vm1, %v2504_v51  ;;  %v2586_v51 = vld [vmem:[#allocation3 + $0x1b4] ss:$12 sps:$4 sm:$0xff]  }
  0x62   : > { %657 = vmatprep.mubr.bf16.mxu1 %v2683_v1 }
  0x64   : > { %1454 = vmatpush1.bf16.msra.mxu0 %v2557_v58  ;;  %v2595_v58 = vld [vmem:[#allocation3 + $0x278] ss:$12 sps:$4 sm:$0xff]  }
  0x65   : > { %1455 = vmatprep.subr.bf16.mxu0 %v2562_v59 }
  0x67   : > { %2170 = vmatmul.mubr.msk.bf16.gmra.mrb[24].mxu0 %vm414_vm1, %v2505_v56 }
  0x68   : > { %554 = vmatprep.mubr.bf16.mxu0 %v2683_v1  ;;  %1456 = vmatpush1.bf16.msra.mxu0 %v2560_v60 }
  0x69   : > { %1457 = vmatprep.subr.bf16.mxu0 %v2567_v62  ;;  %2179 = vmatmul.mubr.msk.bf16.gmra.mrb[24].mxu1 %vm414_vm1, %v2505_v56 }
  0x6a   : > { %667 = vmatprep.mubr.bf16.mxu1 %v2683_v1  ;;  %v324_v1 = vlaneseq }
  0x6c   : > { %1458 = vmatpush1.bf16.msra.mxu0 %v2565_v63  ;;  %v325_v9 = vshrl.u32 %v324_v1, 7 }
  0x6d   : > { %1459 = vmatprep.subr.bf16.mxu0 %v2570_v0 }
  0x6e   : > { %v2847_v10 = vsub.s32 0, %v325_v9  ;;  %v2852_v12 = vsub.s32 1, %v325_v9  ;;  %v2862_v20 = vsub.s32 2, %v325_v9  ;;  %v338_v23 = vsub.s32 3, %v325_v9  ;;  %v2591_v9 = vld [vmem:[#allocation3 + $0x1cc] ss:$12 sps:$4 sm:$0xff]  }
  0x6f   : > { %2171 = vmatmul.mubr.msk.bf16.gmra.mrb[28].mxu0 %vm414_vm1, %v2509_v61 }
  0x70   : > { %1460 = vmatpush1.bf16.msra.mxu0 %v2568_v2  ;;  %v2855_v13 = vrot.slane %v322_v11, %v2847_v10  ;;  %v2858_v14 = vrot.slane %v322_v11, %v2852_v12  ;;  %v2867_v29 = vrot.slane %v322_v11, %v2862_v20  ;;  %v2869_v31 = vrot.slane %v322_v11, %v338_v23  ;;  %v2603_v11 = vld [vmem:[#allocation3 + $0x290] ss:$12 sps:$4 sm:$0xff]  }
  0x71   : > { %2180 = vmatmul.mubr.msk.bf16.gmra.mrb[28].mxu1 %vm414_vm1, %v2509_v61  ;;  %1461 = vmatprep.subr.bf16.mxu0 %v2575_v4 }
  0x74   : > { %1462 = vmatpush1.bf16.msra.mxu0 %v2573_v6  ;;  %v2596_v6 = vld [vmem:[#allocation3 + $0x1b8] ss:$12 sps:$4 sm:$0xff]  }
  0x75   : > { %1544 = vmatprep.subr.bf16.mxu0 %v2578_v7 }
 0x10a   : > { %v486_v15 = vpop.f32.mrb[0].mxu0 }
 0x10b   : > { %v487_v16 = vadd.f32 %v486_v15, %v2855_v13  ;;  %v488_v17 = vpop.f32.mrb[1].mxu0 }
 0x10c   : > { %v489_v18 = vadd.f32 %v488_v17, %v2858_v14  ;;  %v490_v19 = vpop.f32.mrb[2].mxu0  ;;  %v599_v40 = vpop.f32.mrb[0].mxu1 }
 0x10d   : > { %v491_v21 = vadd.f32 %v490_v19, %v2855_v13  ;;  %v492_v22 = vpop.f32.mrb[3].mxu0  ;;  %v678_v25 = vmax.f32 %v487_v16, 0.0  ;;  %v600_v43 = vadd.f32 %v599_v40, %v2867_v29  ;;  %v601_v44 = vpop.f32.mrb[1].mxu1 }
 0x10e   : > { %v493_v24 = vadd.f32 %v492_v22, %v2858_v14  ;;  %v679_v27 = vmax.f32 %v489_v18, 0.0  ;;  %v602_v48 = vadd.f32 %v601_v44, %v2869_v31  ;;  %v603_v49 = vpop.f32.mrb[2].mxu1 }
 0x10f   : > { %v682_v26 = vmax.f32 %v491_v21, 0.0  ;;  %v680_v53 = vmax.f32 %v600_v43, 0.0  ;;  %v604_v54 = vadd.f32 %v603_v49, %v2867_v29  ;;  %v605_v55 = vpop.f32.mrb[3].mxu1 }
 0x110   : > { %v683_v28 = vmax.f32 %v493_v24, 0.0  ;;  %v681_v59 = vmax.f32 %v602_v48, 0.0  ;;  %v606_v60 = vadd.f32 %v605_v55, %v2869_v31  ;;  %v2589_v24 = vld [vmem:[#allocation3 + $0x1c8] ss:$12 sps:$4 sm:$0xff]  }
 0x111   : > { %v742_v30 = vpack.c.bf16 %v682_v26, %v678_v25  ;;  %v684_v63 = vmax.f32 %v604_v54, 0.0  ;;  %v2612_v48 = vld [vmem:[#allocation3 + $0x1e8] ss:$12 sps:$4 sm:$0xff]  }
 0x112   : > { %v743_v32 = vpack.c.bf16 %v683_v28, %v679_v27  ;;  %v496_v33 = vpop.f32.mrb[4].mxu0  ;;  %v685_v2 = vmax.f32 %v606_v60, 0.0  ;;  %v2594_v28 = vld [vmem:[#allocation3 + $0x1e4] ss:$12 sps:$4 sm:$0xff]  }
 0x113   : > { %v497_v36 = vadd.f32 %v496_v33, %v2855_v13  ;;  %v498_v37 = vpop.f32.mrb[5].mxu0  ;;  %v2879_v7 = vpack.c.bf16 %v684_v63, %v680_v53  ;;  %v2619_v53 = vld [vmem:[#allocation3 + $0x2c0] ss:$12 sps:$4 sm:$0xff]  }
 0x114   : > { %v499_v41 = vadd.f32 %v498_v37, %v2858_v14  ;;  %v500_v42 = vpop.f32.mrb[6].mxu0  ;;  %1463 = vmatprep.mubr.bf16.mxu0 %v743_v32  ;;  %1689 = vmatprep.mubr.bf16.mxu1 %v743_v32  ;;  %v2882_v15 = vpack.c.bf16 %v685_v2, %v681_v59  ;;  %v609_v16 = vpop.f32.mrb[4].mxu1  ;;  %v2611_v37 = vld [vmem:[#allocation3 + $0x2a8] ss:$12 sps:$4 sm:$0xff]  }
 0x115   : > { %v501_v45 = vadd.f32 %v500_v42, %v2855_v13  ;;  %v502_v46 = vpop.f32.mrb[7].mxu0  ;;  %1464 = vmatmul.mubr.bf16.vlgmr.msra.gmra.mrb[32].mxu0 %v742_v30  ;;  %1690 = vmatmul.mubr.bf16.vlgmr.msra.gmra.mrb[32].mxu1 %v742_v30  ;;  %v686_v56 = vmax.f32 %v497_v36, 0.0  ;;  %v610_v19 = vadd.f32 %v609_v16, %v2867_v29  ;;  %v611_v21 = vpop.f32.mrb[5].mxu1  ;;  %v2604_v30 = vld [vmem:[#allocation3 + $0x1d0] ss:$12 sps:$4 sm:$0xff]  }
 0x116   : > { %v503_v50 = vadd.f32 %v502_v46, %v2858_v14  ;;  %1545 = vmatpush1.bf16.msra.mxu0 %v2576_v34  ;;  %2345 = vmatpush3.bf16.msra.mxu1 %v2580_v35  ;;  %v687_v61 = vmax.f32 %v499_v41, 0.0  ;;  %v612_v25 = vadd.f32 %v611_v21, %v2869_v31  ;;  %v613_v26 = vpop.f32.mrb[6].mxu1 }
 0x117   : > { %v690_v57 = vmax.f32 %v501_v45, 0.0  ;;  %1546 = vmatprep.subr.bf16.mxu0 %v2583_v38  ;;  %2346 = vmatprep.subr.bf16.mxu1 %v2587_v39  ;;  %v688_v32 = vmax.f32 %v610_v19, 0.0  ;;  %v614_v33 = vadd.f32 %v613_v26, %v2867_v29  ;;  %v615_v34 = vpop.f32.mrb[7].mxu1  ;;  %v2600_v26 = vld [vmem:[#allocation3 + $0x210] ss:$12 sps:$4 sm:$0xff]  }
 0x118   : > { %v691_v62 = vmax.f32 %v503_v50, 0.0  ;;  %v689_v38 = vmax.f32 %v612_v25, 0.0  ;;  %v616_v39 = vadd.f32 %v615_v34, %v2869_v31  ;;  %v2635_v34 = vld [vmem:[#allocation3 + $0x2f0] ss:$12 sps:$4 sm:$0xff]  }
 0x119   : > { %v746_v0 = vpack.c.bf16 %v690_v57, %v686_v56  ;;  %v692_v42 = vmax.f32 %v614_v33, 0.0  ;;  %v2607_v33 = vld [vmem:[#allocation3 + $0x22c] ss:$12 sps:$4 sm:$0xff]  }
 0x11a   : > { %v747_v3 = vpack.c.bf16 %v691_v62, %v687_v61  ;;  %1547 = vmatpush1.bf16.msra.mxu0 %v2581_v47  ;;  %v506_v4 = vpop.f32.mrb[8].mxu0  ;;  %2347 = vmatpush3.bf16.msra.mxu1 %v2588_v52  ;;  %v693_v44 = vmax.f32 %v616_v39, 0.0  ;;  %v2592_v47 = vld [vmem:[#allocation3 + $0x1e0] ss:$12 sps:$4 sm:$0xff]   ;;  %v2599_v52 = vld [vmem:[#allocation3 + $0x1fc] ss:$12 sps:$4 sm:$0xff]  }
 0x11b   : > { %v507_v8 = vadd.f32 %v506_v4, %v2855_v13  ;;  %v508_v1 = vpop.f32.mrb[9].mxu0  ;;  %1548 = vmatprep.subr.bf16.mxu0 %v2586_v51  ;;  %2348 = vmatprep.subr.bf16.mxu1 %v2595_v58  ;;  %v2891_v49 = vpack.c.bf16 %v692_v42, %v688_v32  ;;  %v2597_v62 = vld [vmem:[#allocation3 + $0x1f8] ss:$12 sps:$4 sm:$0xff]   ;;  %v2620_v4 = vld [vmem:[#allocation3 + $0x200] ss:$12 sps:$4 sm:$0xff]  }
 0x11c   : > { %v509_v17 = vadd.f32 %v508_v1, %v2858_v14  ;;  %v510_v18 = vpop.f32.mrb[10].mxu0  ;;  %1473 = vmatprep.mubr.bf16.mxu0 %v747_v3  ;;  %1697 = vmatprep.mubr.bf16.mxu1 %v747_v3  ;;  %v2894_v54 = vpack.c.bf16 %v693_v44, %v689_v38  ;;  %v619_v55 = vpop.f32.mrb[8].mxu1  ;;  %v2602_v3 = vld [vmem:[#allocation3 + $0x214] ss:$12 sps:$4 sm:$0xff]  }
 0x11d   : > { %v511_v22 = vadd.f32 %v510_v18, %v2855_v13  ;;  %v512_v23 = vpop.f32.mrb[11].mxu0  ;;  %1474 = vmatmul.mubr.bf16.gmra.mrb[36].mxu0 %v746_v0  ;;  %1698 = vmatmul.mubr.bf16.gmra.mrb[36].mxu1 %v746_v0  ;;  %v694_v35 = vmax.f32 %v507_v8, 0.0  ;;  %v620_v58 = vadd.f32 %v619_v55, %v2867_v29  ;;  %v621_v59 = vpop.f32.mrb[9].mxu1  ;;  %v2610_v55 = vld [vmem:[#allocation3 + $0x244] ss:$12 sps:$4 sm:$0xff]  }
 0x11e   : > { %v513_v27 = vadd.f32 %v512_v23, %v2858_v14  ;;  %1549 = vmatpush1.bf16.msra.mxu0 %v2584_v5  ;;  %2349 = vmatpush3.bf16.msra.mxu1 %v2596_v6  ;;  %v695_v40 = vmax.f32 %v509_v17, 0.0  ;;  %v622_v63 = vadd.f32 %v621_v59, %v2869_v31  ;;  %v623_v0 = vpop.f32.mrb[10].mxu1 }
 0x11f   : > { %v698_v36 = vmax.f32 %v511_v22, 0.0  ;;  %1550 = vmatprep.subr.bf16.mxu0 %v2591_v9  ;;  %2350 = vmatprep.subr.bf16.mxu1 %v2603_v11  ;;  %v696_v5 = vmax.f32 %v620_v58, 0.0  ;;  %v624_v6 = vadd.f32 %v623_v0, %v2867_v29  ;;  %v625_v8 = vpop.f32.mrb[11].mxu1  ;;  %v2627_v11 = vld [vmem:[#allocation3 + $0x2d8] ss:$12 sps:$4 sm:$0xff]  }
 0x120   : > { %v699_v41 = vmax.f32 %v513_v27, 0.0  ;;  %v697_v16 = vmax.f32 %v622_v63, 0.0  ;;  %v626_v17 = vadd.f32 %v625_v8, %v2869_v31  ;;  %v2628_v27 = vld [vmem:[#allocation3 + $0x218] ss:$12 sps:$4 sm:$0xff]  }
 0x121   : > { %v750_v43 = vpack.c.bf16 %v698_v36, %v694_v35  ;;  %v700_v21 = vmax.f32 %v624_v6, 0.0  ;;  %v2615_v6 = vld [vmem:[#allocation3 + $0x25c] ss:$12 sps:$4 sm:$0xff]  }
 0x122   : > { %v751_v45 = vpack.c.bf16 %v699_v41, %v695_v40  ;;  %1551 = vmatpush1.bf16.msra.mxu0 %v2589_v24  ;;  %v516_v46 = vpop.f32.mrb[12].mxu0  ;;  %2351 = vmatpush3.bf16.msra.mxu1 %v2604_v30  ;;  %v701_v23 = vmax.f32 %v626_v17, 0.0 }
 0x123   : > { %v517_v50 = vadd.f32 %v516_v46, %v2855_v13  ;;  %v518_v51 = vpop.f32.mrb[13].mxu0  ;;  %1552 = vmatprep.subr.bf16.mxu0 %v2594_v28  ;;  %2352 = vmatprep.subr.bf16.mxu1 %v2611_v37  ;;  %v2903_v28 = vpack.c.bf16 %v700_v21, %v696_v5  ;;  %v2605_v46 = vld [vmem:[#allocation3 + $0x228] ss:$12 sps:$4 sm:$0xff]  }
 0x124   : > { %v519_v56 = vadd.f32 %v518_v51, %v2858_v14  ;;  %v520_v57 = vpop.f32.mrb[14].mxu0  ;;  %1483 = vmatprep.mubr.bf16.mxu0 %v751_v45  ;;  %1705 = vmatprep.mubr.bf16.mxu1 %v751_v45  ;;  %v2906_v35 = vpack.c.bf16 %v701_v23, %v697_v16  ;;  %v629_v36 = vpop.f32.mrb[12].mxu1 }
 0x125   : > { %v521_v60 = vadd.f32 %v520_v57, %v2855_v13  ;;  %v522_v61 = vpop.f32.mrb[15].mxu0  ;;  %1484 = vmatmul.mubr.bf16.gmra.mrb[40].mxu0 %v750_v43  ;;  %1706 = vmatmul.mubr.bf16.gmra.mrb[40].mxu1 %v750_v43  ;;  %v702_v1 = vmax.f32 %v517_v50, 0.0  ;;  %v630_v39 = vadd.f32 %v629_v36, %v2867_v29  ;;  %v631_v40 = vpop.f32.mrb[13].mxu1 }
 0x126   : > { %v523_v2 = vadd.f32 %v522_v61, %v2858_v14  ;;  %1553 = vmatpush1.bf16.msra.mxu0 %v2592_v47  ;;  %2353 = vmatpush3.bf16.msra.mxu1 %v2612_v48  ;;  %v703_v18 = vmax.f32 %v519_v56, 0.0  ;;  %v632_v43 = vadd.f32 %v631_v40, %v2869_v31  ;;  %v633_v44 = vpop.f32.mrb[14].mxu1  ;;  %v2636_v47 = vld [vmem:[#allocation3 + $0x230] ss:$12 sps:$4 sm:$0xff]  }
 0x127   : > { %v706_v9 = vmax.f32 %v521_v60, 0.0  ;;  %1554 = vmatprep.subr.bf16.mxu0 %v2599_v52  ;;  %2354 = vmatprep.subr.bf16.mxu1 %v2619_v53  ;;  %v704_v48 = vmax.f32 %v630_v39, 0.0  ;;  %v634_v50 = vadd.f32 %v633_v44, %v2867_v29  ;;  %v635_v51 = vpop.f32.mrb[15].mxu1  ;;  %v2616_v44 = vld [vmem:[#allocation3 + $0x270] ss:$12 sps:$4 sm:$0xff]  }
 0x128   : > { %v707_v19 = vmax.f32 %v523_v2, 0.0  ;;  %v705_v56 = vmax.f32 %v632_v43, 0.0  ;;  %v636_v57 = vadd.f32 %v635_v51, %v2869_v31  ;;  %v2608_v2 = vld [vmem:[#allocation3 + $0x240] ss:$12 sps:$4 sm:$0xff]  }
 0x129   : > { %v754_v22 = vpack.c.bf16 %v706_v9, %v702_v1  ;;  %v708_v60 = vmax.f32 %v634_v50, 0.0 }
 0x12a   : > { %v755_v24 = vpack.c.bf16 %v707_v19, %v703_v18  ;;  %1555 = vmatpush1.bf16.msra.mxu0 %v2597_v62  ;;  %v526_v25 = vpop.f32.mrb[16].mxu0  ;;  %2355 = vmatpush3.bf16.msra.mxu1 %v2620_v4  ;;  %v709_v62 = vmax.f32 %v636_v57, 0.0 }
 0x12b   : > { %v527_v30 = vadd.f32 %v526_v25, %v2855_v13  ;;  %v528_v32 = vpop.f32.mrb[17].mxu0  ;;  %1556 = vmatprep.subr.bf16.mxu0 %v2602_v3  ;;  %2356 = vmatprep.subr.bf16.mxu1 %v2627_v11  ;;  %v2915_v3 = vpack.c.bf16 %v708_v60, %v704_v48  ;;  %v2623_v48 = vld [vmem:[#allocation3 + $0x28c] ss:$12 sps:$4 sm:$0xff]  }
 0x12c   : > { %v529_v37 = vadd.f32 %v528_v32, %v2858_v14  ;;  %v530_v38 = vpop.f32.mrb[18].mxu0  ;;  %1493 = vmatprep.mubr.bf16.mxu0 %v755_v24  ;;  %1713 = vmatprep.mubr.bf16.mxu1 %v755_v24  ;;  %v2918_v8 = vpack.c.bf16 %v709_v62, %v705_v56  ;;  %v639_v1 = vpop.f32.mrb[16].mxu1  ;;  %v2613_v24 = vld [vmem:[#allocation3 + $0x258] ss:$12 sps:$4 sm:$0xff]   ;;  %v2621_v62 = vld [vmem:[#allocation3 + $0x288] ss:$12 sps:$4 sm:$0xff]  }
 0x12d   : > { %v531_v41 = vadd.f32 %v530_v38, %v2855_v13  ;;  %v532_v42 = vpop.f32.mrb[19].mxu0  ;;  %1494 = vmatmul.mubr.bf16.gmra.mrb[44].mxu0 %v754_v22  ;;  %1714 = vmatmul.mubr.bf16.gmra.mrb[44].mxu1 %v754_v22  ;;  %v710_v52 = vmax.f32 %v527_v30, 0.0  ;;  %v640_v16 = vadd.f32 %v639_v1, %v2867_v29  ;;  %v641_v17 = vpop.f32.mrb[17].mxu1 }
 0x12e   : > { %v533_v45 = vadd.f32 %v532_v42, %v2858_v14  ;;  %1557 = vmatpush1.bf16.msra.mxu0 %v2600_v26  ;;  %2357 = vmatpush3.bf16.msra.mxu1 %v2628_v27  ;;  %v711_v58 = vmax.f32 %v529_v37, 0.0  ;;  %v642_v21 = vadd.f32 %v641_v17, %v2869_v31  ;;  %v643_v22 = vpop.f32.mrb[18].mxu1 }
 0x12f   : > { %v714_v53 = vmax.f32 %v531_v41, 0.0  ;;  %1558 = vmatprep.subr.bf16.mxu0 %v2607_v33  ;;  %2358 = vmatprep.subr.bf16.mxu1 %v2635_v34  ;;  %v712_v25 = vmax.f32 %v640_v16, 0.0  ;;  %v644_v26 = vadd.f32 %v643_v22, %v2867_v29  ;;  %v645_v27 = vpop.f32.mrb[19].mxu1  ;;  %v2618_v33 = vld [vmem:[#allocation3 + $0x274] ss:$12 sps:$4 sm:$0xff]  }
 0x130   : > { %v715_v59 = vmax.f32 %v533_v45, 0.0  ;;  %v713_v34 = vmax.f32 %v642_v21, 0.0  ;;  %v646_v36 = vadd.f32 %v645_v27, %v2869_v31  ;;  %v2631_v27 = vld [vmem:[#allocation3 + $0x2bc] ss:$12 sps:$4 sm:$0xff]  }
 0x131   : > { %v758_v61 = vpack.c.bf16 %v714_v53, %v710_v52  ;;  %v716_v39 = vmax.f32 %v644_v26, 0.0 }
 0x132   : > { %v759_v63 = vpack.c.bf16 %v715_v59, %v711_v58  ;;  %1559 = vmatpush1.bf16.msra.mxu0 %v2605_v46  ;;  %v536_v0 = vpop.f32.mrb[20].mxu0  ;;  %2359 = vmatpush3.bf16.msra.mxu1 %v2636_v47  ;;  %v717_v41 = vmax.f32 %v646_v36, 0.0 }
 0x133   : > { %v537_v4 = vadd.f32 %v536_v0, %v2855_v13  ;;  %v538_v5 = vpop.f32.mrb[21].mxu0  ;;  %1560 = vmatprep.subr.bf16.mxu0 %v2610_v55  ;;  %v2927_v45 = vpack.c.bf16 %v716_v39, %v712_v25 }
 0x134   : > { %v539_v9 = vadd.f32 %v538_v5, %v2858_v14  ;;  %v540_v11 = vpop.f32.mrb[22].mxu0  ;;  %1503 = vmatprep.mubr.bf16.mxu0 %v759_v63  ;;  %1721 = vmatprep.mubr.bf16.mxu1 %v759_v63  ;;  %v2930_v50 = vpack.c.bf16 %v717_v41, %v713_v34  ;;  %v649_v51 = vpop.f32.mrb[20].mxu1 }
 0x135   : > { %v541_v18 = vadd.f32 %v540_v11, %v2855_v13  ;;  %v542_v19 = vpop.f32.mrb[23].mxu0  ;;  %1504 = vmatmul.mubr.bf16.gmra.mrb[48].mxu0 %v758_v61  ;;  %1722 = vmatmul.mubr.bf16.gmra.mrb[48].mxu1 %v758_v61  ;;  %v718_v30 = vmax.f32 %v537_v4, 0.0  ;;  %v650_v55 = vadd.f32 %v649_v51, %v2867_v29  ;;  %v651_v56 = vpop.f32.mrb[21].mxu1 }
 0x136   : > { %v543_v23 = vadd.f32 %v542_v19, %v2858_v14  ;;  %1561 = vmatpush1.bf16.msra.mxu0 %v2608_v2  ;;  %v719_v37 = vmax.f32 %v539_v9, 0.0  ;;  %v652_v59 = vadd.f32 %v651_v56, %v2869_v31  ;;  %v653_v60 = vpop.f32.mrb[22].mxu1 }
 0x137   : > { %v722_v32 = vmax.f32 %v541_v18, 0.0  ;;  %1562 = vmatprep.subr.bf16.mxu0 %v2615_v6  ;;  %v720_v63 = vmax.f32 %v650_v55, 0.0  ;;  %v654_v0 = vadd.f32 %v653_v60, %v2867_v29  ;;  %v655_v2 = vpop.f32.mrb[23].mxu1  ;;  %v2626_v6 = vld [vmem:[#allocation3 + $0x2a4] ss:$12 sps:$4 sm:$0xff]  }
 0x138   : > { %v723_v38 = vmax.f32 %v543_v23, 0.0  ;;  %v721_v1 = vmax.f32 %v652_v59, 0.0  ;;  %v656_v9 = vadd.f32 %v655_v2, %v2869_v31  ;;  %v2624_v23 = vld [vmem:[#allocation3 + $0x2a0] ss:$12 sps:$4 sm:$0xff]  }
 0x139   : > { %v762_v40 = vpack.c.bf16 %v722_v32, %v718_v30  ;;  %v724_v17 = vmax.f32 %v654_v0, 0.0 }
 0x13a   : > { %v763_v42 = vpack.c.bf16 %v723_v38, %v719_v37  ;;  %1563 = vmatpush1.bf16.msra.mxu0 %v2613_v24  ;;  %v546_v43 = vpop.f32.mrb[24].mxu0  ;;  %v725_v19 = vmax.f32 %v656_v9, 0.0 }
 0x13b   : > { %v547_v46 = vadd.f32 %v546_v43, %v2855_v13  ;;  %v548_v47 = vpop.f32.mrb[25].mxu0  ;;  %1564 = vmatprep.subr.bf16.mxu0 %v2618_v33  ;;  %v2939_v24 = vpack.c.bf16 %v724_v17, %v720_v63  ;;  %v2629_v43 = vld [vmem:[#allocation3 + $0x2b8] ss:$12 sps:$4 sm:$0xff]  }
 0x13c   : > { %v549_v52 = vadd.f32 %v548_v47, %v2858_v14  ;;  %v550_v53 = vpop.f32.mrb[26].mxu0  ;;  %1513 = vmatprep.mubr.bf16.mxu0 %v763_v42  ;;  %1729 = vmatprep.mubr.bf16.mxu1 %v763_v42  ;;  %v2942_v30 = vpack.c.bf16 %v725_v19, %v721_v1  ;;  %v659_v32 = vpop.f32.mrb[24].mxu1  ;;  %v2637_v1 = vld [vmem:[#allocation3 + $0x2e8] ss:$12 sps:$4 sm:$0xff]  }
 0x13d   : > { %v551_v57 = vadd.f32 %v550_v53, %v2855_v13  ;;  %v552_v58 = vpop.f32.mrb[27].mxu0  ;;  %1514 = vmatmul.mubr.bf16.gmra.mrb[52].mxu0 %v762_v40  ;;  %1730 = vmatmul.mubr.bf16.gmra.mrb[52].mxu1 %v762_v40  ;;  %v726_v4 = vmax.f32 %v547_v46, 0.0  ;;  %v660_v36 = vadd.f32 %v659_v32, %v2867_v29  ;;  %v661_v37 = vpop.f32.mrb[25].mxu1 }
 0x13e   : > { %v553_v61 = vadd.f32 %v552_v58, %v2858_v14  ;;  %1565 = vmatpush1.bf16.msra.mxu0 %v2616_v44  ;;  %v727_v11 = vmax.f32 %v549_v52, 0.0  ;;  %v662_v40 = vadd.f32 %v661_v37, %v2869_v31  ;;  %v663_v41 = vpop.f32.mrb[26].mxu1  ;;  %v2634_v52 = vld [vmem:[#allocation3 + $0x2d4] ss:$12 sps:$4 sm:$0xff]  }
 0x13f   : > { %v730_v5 = vmax.f32 %v551_v57, 0.0  ;;  %1566 = vmatprep.subr.bf16.mxu0 %v2623_v48  ;;  %v728_v44 = vmax.f32 %v660_v36, 0.0  ;;  %v664_v46 = vadd.f32 %v663_v41, %v2867_v29  ;;  %v665_v47 = vpop.f32.mrb[27].mxu1 }
 0x140   : > { %v731_v16 = vmax.f32 %v553_v61, 0.0  ;;  %v729_v53 = vmax.f32 %v662_v40, 0.0 }
 0x141   : > { %v766_v18 = vpack.c.bf16 %v730_v5, %v726_v4  ;;  %v732_v57 = vmax.f32 %v664_v46, 0.0 }
 0x142   : > { %v767_v21 = vpack.c.bf16 %v731_v16, %v727_v11  ;;  %1567 = vmatpush1.bf16.msra.mxu0 %v2621_v62  ;;  %v556_v22 = vpop.f32.mrb[28].mxu0  ;;  %v2639_v62 = vld [vmem:[#allocation3 + $0x2ec] ss:$12 sps:$4 sm:$0xff]  }
 0x143   : > { %v557_v25 = vadd.f32 %v556_v22, %v2855_v13  ;;  %v558_v26 = vpop.f32.mrb[29].mxu0  ;;  %1568 = vmatprep.subr.bf16.mxu0 %v2626_v6  ;;  %v768_v61 = vpack.c.bf16 %v732_v57, %v728_v44 }
 0x144   : > { %v559_v33 = vadd.f32 %v558_v26, %v2858_v14  ;;  %v560_v34 = vpop.f32.mrb[30].mxu0  ;;  %1523 = vmatprep.mubr.bf16.mxu0 %v767_v21  ;;  %1737 = vmatprep.mubr.bf16.mxu1 %v767_v21  ;;  %v669_v0 = vpop.f32.mrb[28].mxu1 }
 0x145   : > { %v561_v38 = vadd.f32 %v560_v34, %v2855_v13  ;;  %v562_v39 = vpop.f32.mrb[31].mxu0  ;;  %1524 = vmatmul.mubr.bf16.gmra.mrb[56].mxu0 %v766_v18  ;;  %1738 = vmatmul.mubr.bf16.gmra.mrb[56].mxu1 %v766_v18  ;;  %v734_v48 = vmax.f32 %v557_v25, 0.0  ;;  %v666_v13 = vadd.f32 %v665_v47, %v2869_v31  ;;  %v670_v2 = vadd.f32 %v669_v0, %v2867_v29  ;;  %v671_v4 = vpop.f32.mrb[29].mxu1  ;;  %v902_v0 = vld [vmem:[%s3186_s4] sm:$0x7] }
 0x146   : > { %v563_v42 = vadd.f32 %v562_v39, %v2858_v14  ;;  %1569 = vmatpush1.bf16.msra.mxu0 %v2624_v23  ;;  %v735_v55 = vmax.f32 %v559_v33, 0.0  ;;  %v2632_v14 = vld [vmem:[#allocation3 + $0x2d0] ss:$12 sps:$4 sm:$0xff]   ;;  %v672_v5 = vadd.f32 %v671_v4, %v2869_v31  ;;  %v673_v6 = vpop.f32.mrb[30].mxu1 }
 0x147   : > { %v738_v51 = vmax.f32 %v561_v38, 0.0  ;;  %1570 = vmatprep.subr.bf16.mxu0 %v2631_v27  ;;  %v733_v59 = vmax.f32 %v666_v13, 0.0  ;;  %v736_v9 = vmax.f32 %v670_v2, 0.0  ;;  %v674_v11 = vadd.f32 %v673_v6, %v2867_v29  ;;  %v675_v16 = vpop.f32.mrb[31].mxu1 }
 0x148   : > { %v739_v56 = vmax.f32 %v563_v42, 0.0  ;;  %v737_v17 = vmax.f32 %v672_v5, 0.0  ;;  %v676_v18 = vadd.f32 %v675_v16, %v2869_v31  ;;  %v3011_v5 = vrot.slane %v902_v0, %v2847_v10 }
 0x149   : > { %v770_v58 = vpack.c.bf16 %v738_v51, %v734_v48  ;;  %v769_v63 = vpack.c.bf16 %v733_v59, %v729_v53  ;;  %v740_v19 = vmax.f32 %v674_v11, 0.0  ;;  %v3014_v6 = vrot.slane %v902_v0, %v2862_v20 }
 0x14a   : > { %v771_v60 = vpack.c.bf16 %v739_v56, %v735_v55  ;;  %1571 = vmatpush1.bf16.msra.mxu0 %v2629_v43  ;;  %v741_v21 = vmax.f32 %v676_v18, 0.0 }
 0x14b   : > { %1572 = vmatprep.subr.bf16.mxu0 %v2634_v52  ;;  %v772_v22 = vpack.c.bf16 %v740_v19, %v736_v9  ;;  %v3020_v9 = vrot.slane %v902_v0, %v2852_v12 }
 0x14c   : > { %1533 = vmatprep.mubr.bf16.mxu0 %v771_v60  ;;  %1745 = vmatprep.mubr.bf16.mxu1 %v771_v60  ;;  %v773_v23 = vpack.c.bf16 %v741_v21, %v737_v17 }
 0x14d   : > { %1534 = vmatmul.mubr.bf16.gmra.mrb[60].mxu0 %v770_v58  ;;  %1746 = vmatmul.mubr.bf16.gmra.mrb[60].mxu1 %v770_v58 }
 0x14e   : > { %1573 = vmatpush1.bf16.msra.mxu0 %v2632_v14  ;;  %1576 = vmatprep.mubr.bf16.mxu0 %v2882_v15 }
 0x14f   : > { %1574 = vmatprep.subr.bf16.mxu0 %v2639_v62  ;;  %1786 = vmatprep.mubr.bf16.mxu1 %v2882_v15 }
 0x152   : > { %1575 = vmatpush1.bf16.msra.mxu0 %v2637_v1  ;;  %v1899_v1 = vld [vmem:[%s3187_s5] sm:$0x7] }
 0x153   : > { %v3024_v18 = vrot.slane %v1899_v1, %v2847_v10 }
 0x155   : > { %1577 = vmatmul.mubr.bf16.vlgmr.msra.gmra.mrb[32].mxu0 %v2879_v7  ;;  %1787 = vmatmul.mubr.bf16.vlgmr.msra.gmra.mrb[64].mxu1 %v2879_v7 }
 0x156   : > { %1586 = vmatprep.mubr.bf16.mxu0 %v2894_v54  ;;  %1794 = vmatprep.mubr.bf16.mxu1 %v2894_v54 }
 0x15d   : > { %1587 = vmatmul.mubr.bf16.gmra.mrb[36].mxu0 %v2891_v49  ;;  %1795 = vmatmul.mubr.bf16.gmra.mrb[68].mxu1 %v2891_v49 }
 0x15e   : > { %1596 = vmatprep.mubr.bf16.mxu0 %v2906_v35  ;;  %1802 = vmatprep.mubr.bf16.mxu1 %v2906_v35 }
 0x165   : > { %1597 = vmatmul.mubr.bf16.gmra.mrb[40].mxu0 %v2903_v28  ;;  %1803 = vmatmul.mubr.bf16.gmra.mrb[72].mxu1 %v2903_v28 }
 0x166   : > { %1606 = vmatprep.mubr.bf16.mxu0 %v2918_v8  ;;  %1810 = vmatprep.mubr.bf16.mxu1 %v2918_v8 }
 0x16d   : > { %1607 = vmatmul.mubr.bf16.gmra.mrb[44].mxu0 %v2915_v3  ;;  %1811 = vmatmul.mubr.bf16.gmra.mrb[76].mxu1 %v2915_v3 }
 0x16e   : > { %1616 = vmatprep.mubr.bf16.mxu0 %v2930_v50  ;;  %1818 = vmatprep.mubr.bf16.mxu1 %v2930_v50 }
 0x175   : > { %1617 = vmatmul.mubr.bf16.gmra.mrb[48].mxu0 %v2927_v45  ;;  %1819 = vmatmul.mubr.bf16.gmra.mrb[80].mxu1 %v2927_v45 }
 0x176   : > { %1626 = vmatprep.mubr.bf16.mxu0 %v2942_v30  ;;  %1826 = vmatprep.mubr.bf16.mxu1 %v2942_v30 }
 0x17d   : > { %1627 = vmatmul.mubr.bf16.gmra.mrb[52].mxu0 %v2939_v24  ;;  %1827 = vmatmul.mubr.bf16.gmra.mrb[84].mxu1 %v2939_v24 }
 0x17e   : > { %1636 = vmatprep.mubr.bf16.mxu0 %v769_v63  ;;  %1834 = vmatprep.mubr.bf16.mxu1 %v769_v63 }
 0x185   : > { %1637 = vmatmul.mubr.bf16.gmra.mrb[56].mxu0 %v768_v61  ;;  %1835 = vmatmul.mubr.bf16.gmra.mrb[88].mxu1 %v768_v61 }
 0x186   : > { %1646 = vmatprep.mubr.bf16.mxu0 %v773_v23  ;;  %1842 = vmatprep.mubr.bf16.mxu1 %v773_v23 }
 0x18d   : > { %1647 = vmatmul.mubr.bf16.gmra.mrb[60].mxu0 %v772_v22  ;;  %1843 = vmatmul.mubr.bf16.gmra.mrb[92].mxu1 %v772_v22 }
 0x1e8   : > { %v2296_v29 = vpop.f32.mrb[32].mxu1 }
 0x1e9   : > { %v2297_v31 = vpop.f32.mrb[33].mxu1 }
 0x1ea   : > { %v2298_v7 = vadd.f32 %v2297_v31, %v2296_v29  ;;  %v2299_v15 = vpop.f32.mrb[34].mxu1  ;;  %v3029_v29 = vrot.slane %v1899_v1, %v2852_v12 }
 0x1eb   : > { %v2300_v49 = vpop.f32.mrb[35].mxu1 }
 0x1ec   : > { %v2301_v54 = vadd.f32 %v2300_v49, %v2299_v15  ;;  %v1692_v22 = vadd.f32 %v2298_v7, %v3014_v6 }
 0x1f0   : > { %v2302_v28 = vpop.f32.mrb[36].mxu1 }
 0x1f1   : > { %v2303_v35 = vpop.f32.mrb[37].mxu1 }
 0x1f2   : > { %v2979_v3 = vadd.f32 %v2303_v35, %v2302_v28  ;;  %v2305_v8 = vpop.f32.mrb[38].mxu1  ;;  %v1695_v28 = vadd.f32 %v2301_v54, %v3014_v6 }
 0x1f3   : > { %v2306_v45 = vpop.f32.mrb[39].mxu1 }
 0x1f4   : > { %v2981_v50 = vadd.f32 %v2306_v45, %v2305_v8 }
 0x1f8   : > { %v2308_v24 = vpop.f32.mrb[40].mxu1 }
 0x1f9   : > { %v2309_v25 = vpop.f32.mrb[41].mxu1 }
 0x1fa   : > { %v2983_v26 = vadd.f32 %v2309_v25, %v2308_v24  ;;  %v2311_v27 = vpop.f32.mrb[42].mxu1  ;;  %v3034_v24 = vrot.slane %v1899_v1, %v2862_v20 }
 0x1fb   : > { %v2312_v30 = vpop.f32.mrb[43].mxu1 }
 0x1fc   : > { %v2985_v32 = vadd.f32 %v2312_v30, %v2311_v27 }
 0x200   : > { %v2314_v33 = vpop.f32.mrb[44].mxu1 }
 0x201   : > { %v2315_v34 = vpop.f32.mrb[45].mxu1 }
 0x202   : > { %v2987_v36 = vadd.f32 %v2315_v34, %v2314_v33  ;;  %v2317_v37 = vpop.f32.mrb[46].mxu1 }
 0x203   : > { %v2318_v38 = vpop.f32.mrb[47].mxu1 }
 0x204   : > { %v2989_v39 = vadd.f32 %v2318_v38, %v2317_v37 }
 0x208   : > { %v2320_v40 = vpop.f32.mrb[48].mxu1 }
 0x209   : > { %v2321_v41 = vpop.f32.mrb[49].mxu1 }
 0x20a   : > { %v2991_v42 = vadd.f32 %v2321_v41, %v2320_v40  ;;  %v2323_v43 = vpop.f32.mrb[50].mxu1 }
 0x20b   : > { %v2324_v44 = vpop.f32.mrb[51].mxu1 }
 0x20c   : > { %v2993_v46 = vadd.f32 %v2324_v44, %v2323_v43 }
 0x210   : > { %v2326_v47 = vpop.f32.mrb[52].mxu1 }
 0x211   : > { %v2327_v48 = vpop.f32.mrb[53].mxu1 }
 0x212   : > { %v2995_v51 = vadd.f32 %v2327_v48, %v2326_v47  ;;  %v2329_v52 = vpop.f32.mrb[54].mxu1 }
 0x213   : > { %v2330_v53 = vpop.f32.mrb[55].mxu1 }
 0x214   : > { %v2997_v13 = vadd.f32 %v2330_v53, %v2329_v52  ;;  %v1700_v52 = vadd.f32 %v2979_v3, %v3014_v6 }
 0x218   : > { %v2332_v55 = vpop.f32.mrb[56].mxu1 }
 0x219   : > { %v2333_v56 = vpop.f32.mrb[57].mxu1 }
 0x21a   : > { %v2999_v57 = vadd.f32 %v2333_v56, %v2332_v55  ;;  %v2335_v58 = vpop.f32.mrb[58].mxu1 }
 0x21b   : > { %v2336_v59 = vpop.f32.mrb[59].mxu1 }
 0x21c   : > { %v3001_v60 = vadd.f32 %v2336_v59, %v2335_v58 }
 0x220   : > { %v2338_v14 = vpop.f32.mrb[60].mxu1 }
 0x221   : > { %v2339_v61 = vpop.f32.mrb[61].mxu1 }
 0x222   : > { %v3003_v62 = vadd.f32 %v2339_v61, %v2338_v14  ;;  %v2341_v63 = vpop.f32.mrb[62].mxu1 }
 0x223   : > { %v2342_v2 = vpop.f32.mrb[63].mxu1 }
 0x224   : > { %v3008_v4 = vadd.f32 %v2342_v2, %v2341_v63  ;;  %v1703_v2 = vadd.f32 %v2981_v50, %v3014_v6 }
 0x228   : > { %v1578_v11 = vpop.f32.mrb[32].mxu0  ;;  %v2360_v16 = vpop.f32.mrb[64].mxu1 }
 0x229   : > { %v2408_v17 = vadd.f32 %v1578_v11, %v3011_v5  ;;  %v1580_v19 = vpop.f32.mrb[33].mxu0  ;;  %v2361_v21 = vpop.f32.mrb[65].mxu1 }
 0x22a   : > { %v2409_v23 = vadd.f32 %v1580_v19, %v3020_v9  ;;  %v2362_v31 = vadd.f32 %v2361_v21, %v2360_v16  ;;  %v1582_v15 = vpop.f32.mrb[34].mxu0  ;;  %v2363_v49 = vpop.f32.mrb[66].mxu1 }
 0x22b   : > { %v1851_v35 = vmax.f32 %v2408_v17, 0.0  ;;  %v2410_v8 = vadd.f32 %v1582_v15, %v3011_v5  ;;  %v1584_v45 = vpop.f32.mrb[35].mxu0  ;;  %v2364_v10 = vpop.f32.mrb[67].mxu1 }
 0x22c   : > { %v1852_v25 = vmax.f32 %v2409_v23, 0.0  ;;  %v1789_v7 = vadd.f32 %v2362_v31, %v1692_v22  ;;  %v2411_v27 = vadd.f32 %v1584_v45, %v3020_v9  ;;  %v2365_v30 = vadd.f32 %v2364_v10, %v2363_v49 }
 0x22d   : > { %v1916_v12 = vmul.f32 %v3024_v18, %v1851_v35  ;;  %v1854_v33 = vmax.f32 %v2410_v8, 0.0 }
 0x22e   : > { %v1917_v34 = vmul.f32 %v3029_v29, %v1852_v25  ;;  %v1853_v37 = vmax.f32 %v1789_v7, 0.0  ;;  %v1855_v54 = vmax.f32 %v2411_v27, 0.0  ;;  %v1792_v38 = vadd.f32 %v2365_v30, %v1695_v28 }
 0x22f   : > { %v1919_v40 = vmul.f32 %v3024_v18, %v1854_v33  ;;  %v1708_v33 = vadd.f32 %v2983_v26, %v3014_v6 }
 0x230   : > { %v1920_v41 = vmul.f32 %v3029_v29, %v1855_v54  ;;  %v1856_v43 = vmax.f32 %v1792_v38, 0.0  ;;  %v1588_v20 = vpop.f32.mrb[36].mxu0  ;;  %v2366_v44 = vpop.f32.mrb[68].mxu1  ;;  %v1918_v47 = vmul.f32 %v3034_v24, %v1853_v37  ;;  %v1964_v48 = vadd.f32 %v1917_v34, %v1916_v12 }
 0x231   : > { %v2412_v53 = vadd.f32 %v1588_v20, %v3011_v5  ;;  %v1590_v55 = vpop.f32.mrb[37].mxu0  ;;  %v2367_v56 = vpop.f32.mrb[69].mxu1 }
 0x232   : > { %v2413_v58 = vadd.f32 %v1590_v55, %v3020_v9  ;;  %v2368_v59 = vadd.f32 %v2367_v56, %v2366_v44  ;;  %v1592_v14 = vpop.f32.mrb[38].mxu0  ;;  %v2369_v61 = vpop.f32.mrb[70].mxu1  ;;  %v1965_v63 = vadd.f32 %v1964_v48, %v1918_v47  ;;  %v1921_v0 = vmul.f32 %v3034_v24, %v1856_v43 }
 0x233   : > { %v1857_v1 = vmax.f32 %v2412_v53, 0.0  ;;  %v2414_v11 = vadd.f32 %v1592_v14, %v3011_v5  ;;  %v1594_v16 = vpop.f32.mrb[39].mxu0  ;;  %v2370_v3 = vpop.f32.mrb[71].mxu1  ;;  %v1968_v17 = vadd.f32 %v1920_v41, %v1919_v40  ;;  %v1711_v47 = vadd.f32 %v2985_v32, %v3014_v6 }
 0x234   : > { %v1858_v19 = vmax.f32 %v2413_v58, 0.0  ;;  %v1797_v21 = vadd.f32 %v2368_v59, %v1700_v52  ;;  %v2415_v22 = vadd.f32 %v1594_v16, %v3020_v9  ;;  %v2371_v23 = vadd.f32 %v2370_v3, %v2369_v61  ;;  %1966 = vadd.xlane.f32.xlu0 %v1965_v63 }
 0x235   : > { %v1922_v31 = vmul.f32 %v3024_v18, %v1857_v1  ;;  %v1860_v15 = vmax.f32 %v2414_v11, 0.0  ;;  %v1969_v49 = vadd.f32 %v1968_v17, %v1921_v0 }
 0x236   : > { %v1923_v28 = vmul.f32 %v3029_v29, %v1858_v19  ;;  %v1859_v35 = vmax.f32 %v1797_v21, 0.0  ;;  %v1861_v50 = vmax.f32 %v2415_v22, 0.0  ;;  %v1800_v8 = vadd.f32 %v2371_v23, %v1703_v2 }
 0x237   : > { %v1925_v45 = vmul.f32 %v3024_v18, %v1860_v15 }
 0x238   : > { %v1926_v10 = vmul.f32 %v3029_v29, %v1861_v50  ;;  %v1862_v25 = vmax.f32 %v1800_v8, 0.0  ;;  %v1598_v7 = vpop.f32.mrb[40].mxu0  ;;  %v2372_v27 = vpop.f32.mrb[72].mxu1  ;;  %1970 = vadd.xlane.f32.xlu0 %v1969_v49  ;;  %v1924_v30 = vmul.f32 %v3034_v24, %v1859_v35  ;;  %v1972_v12 = vadd.f32 %v1923_v28, %v1922_v31 }
 0x239   : > { %v2416_v34 = vadd.f32 %v1598_v7, %v3011_v5  ;;  %v1600_v37 = vpop.f32.mrb[41].mxu0  ;;  %v2373_v54 = vpop.f32.mrb[73].mxu1  ;;  %v1716_v31 = vadd.f32 %v2987_v36, %v3014_v6  ;;  %v1719_v7 = vadd.f32 %v2989_v39, %v3014_v6 }
 0x23a   : > { %v2417_v38 = vadd.f32 %v1600_v37, %v3020_v9  ;;  %v2374_v40 = vadd.f32 %v2373_v54, %v2372_v27  ;;  %v1602_v41 = vpop.f32.mrb[42].mxu0  ;;  %v2375_v43 = vpop.f32.mrb[74].mxu1  ;;  %v1973_v20 = vadd.f32 %v1972_v12, %v1924_v30  ;;  %v1927_v44 = vmul.f32 %v3034_v24, %v1862_v25 }
 0x23b   : > { %v1863_v48 = vmax.f32 %v2416_v34, 0.0  ;;  %v2418_v52 = vadd.f32 %v1602_v41, %v3011_v5  ;;  %v1604_v53 = vpop.f32.mrb[43].mxu0  ;;  %v2376_v26 = vpop.f32.mrb[75].mxu1  ;;  %v1976_v55 = vadd.f32 %v1926_v10, %v1925_v45 }
 0x23c   : > { %v1864_v56 = vmax.f32 %v2417_v38, 0.0  ;;  %v1805_v58 = vadd.f32 %v2374_v40, %v1708_v33  ;;  %v2419_v59 = vadd.f32 %v1604_v53, %v3020_v9  ;;  %v2377_v14 = vadd.f32 %v2376_v26, %v2375_v43  ;;  %1974 = vadd.xlane.f32.xlu1 %v1973_v20 }
 0x23d   : > { %v1928_v61 = vmul.f32 %v3024_v18, %v1863_v48  ;;  %v1866_v63 = vmax.f32 %v2418_v52, 0.0  ;;  %v1977_v0 = vadd.f32 %v1976_v55, %v1927_v44 }
 0x23e   : > { %v1929_v2 = vmul.f32 %v3029_v29, %v1864_v56  ;;  %v1865_v1 = vmax.f32 %v1805_v58, 0.0  ;;  %v1867_v32 = vmax.f32 %v2419_v59, 0.0  ;;  %v1808_v11 = vadd.f32 %v2377_v14, %v1711_v47 }
 0x23f   : > { %v1931_v16 = vmul.f32 %v3024_v18, %v1866_v63  ;;  %v1724_v59 = vadd.f32 %v2991_v42, %v3014_v6 }
 0x240   : > { %v1932_v3 = vmul.f32 %v3029_v29, %v1867_v32  ;;  %v1868_v17 = vmax.f32 %v1808_v11, 0.0  ;;  %v1608_v19 = vpop.f32.mrb[44].mxu0  ;;  %v2378_v21 = vpop.f32.mrb[76].mxu1  ;;  %1978 = vadd.xlane.f32.xlu1 %v1977_v0  ;;  %v1930_v22 = vmul.f32 %v3034_v24, %v1865_v1  ;;  %v1980_v23 = vadd.f32 %v1929_v2, %v1928_v61 }
 0x241   : > { %v2420_v15 = vadd.f32 %v1608_v19, %v3011_v5  ;;  %v1610_v49 = vpop.f32.mrb[45].mxu0  ;;  %v2379_v28 = vpop.f32.mrb[77].mxu1 }
 0x242   : > { %v2421_v35 = vadd.f32 %v1610_v49, %v3020_v9  ;;  %v2380_v50 = vadd.f32 %v2379_v28, %v2378_v21  ;;  %v1612_v8 = vpop.f32.mrb[46].mxu0  ;;  %v2381_v45 = vpop.f32.mrb[78].mxu1  ;;  %v1981_v10 = vadd.f32 %v1980_v23, %v1930_v22  ;;  %v1933_v25 = vmul.f32 %v3034_v24, %v1868_v17 }
 0x243   : > { %v1869_v27 = vmax.f32 %v2420_v15, 0.0  ;;  %v2422_v30 = vadd.f32 %v1612_v8, %v3011_v5  ;;  %v1614_v12 = vpop.f32.mrb[47].mxu0  ;;  %v2382_v36 = vpop.f32.mrb[79].mxu1  ;;  %v1984_v33 = vadd.f32 %v1932_v3, %v1931_v16  ;;  %v1727_v3 = vadd.f32 %v2993_v46, %v3014_v6 }
 0x244   : > { %v1870_v34 = vmax.f32 %v2421_v35, 0.0  ;;  %v1813_v37 = vadd.f32 %v2380_v50, %v1716_v31  ;;  %v2423_v54 = vadd.f32 %v1614_v12, %v3020_v9  ;;  %v2383_v38 = vadd.f32 %v2382_v36, %v2381_v45  ;;  %1982 = vadd.xlane.f32.xlu0 %v1981_v10 }
 0x245   : > { %v1934_v40 = vmul.f32 %v3024_v18, %v1869_v27  ;;  %v1872_v41 = vmax.f32 %v2422_v30, 0.0  ;;  %v1985_v43 = vadd.f32 %v1984_v33, %v1933_v25 }
 0x246   : > { %v1935_v20 = vmul.f32 %v3029_v29, %v1870_v34  ;;  %v1871_v44 = vmax.f32 %v1813_v37, 0.0  ;;  %v1873_v39 = vmax.f32 %v2423_v54, 0.0  ;;  %v1816_v47 = vadd.f32 %v2383_v38, %v1719_v7 }
 0x247   : > { %v1937_v48 = vmul.f32 %v3024_v18, %v1872_v41  ;;  %1986 = vadd.xlane.f32.xlu1 %v1985_v43  ;;  %v1732_v34 = vadd.f32 %v2995_v51, %v3014_v6 }
 0x248   : > { %v1938_v52 = vmul.f32 %v3029_v29, %v1873_v39  ;;  %v1874_v53 = vmax.f32 %v1816_v47, 0.0  ;;  %v1618_v26 = vpop.f32.mrb[48].mxu0  ;;  %v2384_v55 = vpop.f32.mrb[80].mxu1  ;;  %v1936_v56 = vmul.f32 %v3034_v24, %v1871_v44  ;;  %v1988_v58 = vadd.f32 %v1935_v20, %v1934_v40 }
 0x249   : > { %v2424_v14 = vadd.f32 %v1618_v26, %v3011_v5  ;;  %v1620_v61 = vpop.f32.mrb[49].mxu0  ;;  %v2385_v63 = vpop.f32.mrb[81].mxu1  ;;  %v1735_v47 = vadd.f32 %v2997_v13, %v3014_v6 }
 0x24a   : > { %v2425_v0 = vadd.f32 %v1620_v61, %v3020_v9  ;;  %v2386_v2 = vadd.f32 %v2385_v63, %v2384_v55  ;;  %v1622_v1 = vpop.f32.mrb[50].mxu0  ;;  %v2387_v32 = vpop.f32.mrb[82].mxu1  ;;  %v1989_v11 = vadd.f32 %v1988_v58, %v1936_v56  ;;  %v1939_v16 = vmul.f32 %v3034_v24, %v1874_v53 }
 0x24b   : > { %v1875_v17 = vmax.f32 %v2424_v14, 0.0  ;;  %v2426_v19 = vadd.f32 %v1622_v1, %v3011_v5  ;;  %v1624_v21 = vpop.f32.mrb[51].mxu0  ;;  %v2388_v42 = vpop.f32.mrb[83].mxu1  ;;  %v1992_v22 = vadd.f32 %v1938_v52, %v1937_v48 }
 0x24c   : > { %v1876_v23 = vmax.f32 %v2425_v0, 0.0  ;;  %v1821_v31 = vadd.f32 %v2386_v2, %v1724_v59  ;;  %v2427_v15 = vadd.f32 %v1624_v21, %v3020_v9  ;;  %v2389_v49 = vadd.f32 %v2388_v42, %v2387_v32  ;;  %1990 = vadd.xlane.f32.xlu0 %v1989_v11 }
 0x24d   : > { %v1940_v28 = vmul.f32 %v3024_v18, %v1875_v17  ;;  %v1878_v35 = vmax.f32 %v2426_v19, 0.0  ;;  %v1993_v50 = vadd.f32 %v1992_v22, %v1939_v16  ;;  %v1740_v42 = vadd.f32 %v2999_v57, %v3014_v6 }
 0x24e   : > { %v1941_v8 = vmul.f32 %v3029_v29, %v1876_v23  ;;  %v1877_v45 = vmax.f32 %v1821_v31, 0.0  ;;  %v1879_v46 = vmax.f32 %v2427_v15, 0.0  ;;  %v1824_v10 = vadd.f32 %v2389_v49, %v1727_v3 }
 0x24f   : > { %v1943_v25 = vmul.f32 %v3024_v18, %v1878_v35  ;;  %1994 = vadd.xlane.f32.xlu1 %v1993_v50 }
 0x250   : > { %v1944_v7 = vmul.f32 %v3029_v29, %v1879_v46  ;;  %v1880_v27 = vmax.f32 %v1824_v10, 0.0  ;;  %v1628_v30 = vpop.f32.mrb[52].mxu0  ;;  %v2390_v12 = vpop.f32.mrb[84].mxu1  ;;  %v1942_v36 = vmul.f32 %v3034_v24, %v1877_v45  ;;  %v1996_v33 = vadd.f32 %v1941_v8, %v1940_v28 }
 0x251   : > { %v2428_v37 = vadd.f32 %v1628_v30, %v3011_v5  ;;  %v1630_v54 = vpop.f32.mrb[53].mxu0  ;;  %v2391_v38 = vpop.f32.mrb[85].mxu1  ;;  %v1743_v45 = vadd.f32 %v3001_v60, %v3014_v6 }
 0x252   : > { %v2429_v40 = vadd.f32 %v1630_v54, %v3020_v9  ;;  %v2392_v41 = vadd.f32 %v2391_v38, %v2390_v12  ;;  %v1632_v43 = vpop.f32.mrb[54].mxu0  ;;  %v2393_v20 = vpop.f32.mrb[86].mxu1  ;;  %v1997_v44 = vadd.f32 %v1996_v33, %v1942_v36  ;;  %v1945_v39 = vmul.f32 %v3034_v24, %v1880_v27 }
 0x253   : > { %v1881_v48 = vmax.f32 %v2428_v37, 0.0  ;;  %v2430_v52 = vadd.f32 %v1632_v43, %v3011_v5  ;;  %v1634_v53 = vpop.f32.mrb[55].mxu0  ;;  %v2394_v51 = vpop.f32.mrb[87].mxu1  ;;  %v2000_v26 = vadd.f32 %v1944_v7, %v1943_v25 }
 0x254   : > { %v1882_v55 = vmax.f32 %v2429_v40, 0.0  ;;  %v1829_v56 = vadd.f32 %v2392_v41, %v1732_v34  ;;  %v2431_v58 = vadd.f32 %v1634_v53, %v3020_v9  ;;  %v2395_v59 = vadd.f32 %v2394_v51, %v2393_v20  ;;  %1998 = vadd.xlane.f32.xlu0 %v1997_v44 }
 0x255   : > { %v1946_v14 = vmul.f32 %v3024_v18, %v1881_v48  ;;  %v1884_v61 = vmax.f32 %v2430_v52, 0.0  ;;  %v2001_v63 = vadd.f32 %v2000_v26, %v1945_v39  ;;  %v1748_v52 = vadd.f32 %v3003_v62, %v3014_v6 }
 0x256   : > { %v1947_v0 = vmul.f32 %v3029_v29, %v1882_v55  ;;  %v1883_v2 = vmax.f32 %v1829_v56, 0.0  ;;  %v1885_v13 = vmax.f32 %v2431_v58, 0.0  ;;  %v1832_v1 = vadd.f32 %v2395_v59, %v1735_v47 }
 0x257   : > { %v1949_v32 = vmul.f32 %v3024_v18, %v1884_v61  ;;  %2002 = vadd.xlane.f32.xlu1 %v2001_v63  ;;  %v1751_v63 = vadd.f32 %v3008_v4, %v3014_v6 }
 0x258   : > { %v1950_v11 = vmul.f32 %v3029_v29, %v1885_v13  ;;  %v1886_v16 = vmax.f32 %v1832_v1, 0.0  ;;  %v1638_v3 = vpop.f32.mrb[56].mxu0  ;;  %v2396_v17 = vpop.f32.mrb[88].mxu1  ;;  %v1948_v19 = vmul.f32 %v3034_v24, %v1883_v2  ;;  %v2004_v21 = vadd.f32 %v1947_v0, %v1946_v14 }
 0x259   : > { %v2432_v22 = vadd.f32 %v1638_v3, %v3011_v5  ;;  %v1640_v23 = vpop.f32.mrb[57].mxu0  ;;  %v2397_v31 = vpop.f32.mrb[89].mxu1 }
 0x25a   : > { %v2433_v15 = vadd.f32 %v1640_v23, %v3020_v9  ;;  %v2398_v49 = vadd.f32 %v2397_v31, %v2396_v17  ;;  %v1642_v28 = vpop.f32.mrb[58].mxu0  ;;  %v2399_v35 = vpop.f32.mrb[90].mxu1  ;;  %v2005_v50 = vadd.f32 %v2004_v21, %v1948_v19  ;;  %v1951_v8 = vmul.f32 %v3034_v24, %v1886_v16 }
 0x25b   : > { %v1887_v46 = vmax.f32 %v2432_v22, 0.0  ;;  %v2434_v10 = vadd.f32 %v1642_v28, %v3011_v5  ;;  %v1644_v25 = vpop.f32.mrb[59].mxu0  ;;  %v2400_v57 = vpop.f32.mrb[91].mxu1  ;;  %v2008_v7 = vadd.f32 %v1950_v11, %v1949_v32 }
 0x25c   : > { %v1888_v27 = vmax.f32 %v2433_v15, 0.0  ;;  %v1837_v30 = vadd.f32 %v2398_v49, %v1740_v42  ;;  %v2435_v12 = vadd.f32 %v1644_v25, %v3020_v9  ;;  %v2401_v36 = vadd.f32 %v2400_v57, %v2399_v35  ;;  %2006 = vadd.xlane.f32.xlu0 %v2005_v50 }
 0x25d   : > { %v1952_v33 = vmul.f32 %v3024_v18, %v1887_v46  ;;  %v1890_v34 = vmax.f32 %v2434_v10, 0.0  ;;  %v2009_v37 = vadd.f32 %v2008_v7, %v1951_v8  ;;  %v2277_v8 = vld [vmem:[#allocation2] ss:$0 sm:$0xff] }
 0x25e   : > { %v1953_v54 = vmul.f32 %v3029_v29, %v1888_v27  ;;  %v1889_v38 = vmax.f32 %v1837_v30, 0.0  ;;  %v1891_v60 = vmax.f32 %v2435_v12, 0.0  ;;  %v1840_v40 = vadd.f32 %v2401_v36, %v1743_v45 }
 0x25f   : > { %v1955_v41 = vmul.f32 %v3024_v18, %v1890_v34  ;;  %2010 = vadd.xlane.f32.xlu1 %v2009_v37 }
 0x260   : > { %v1956_v43 = vmul.f32 %v3029_v29, %v1891_v60  ;;  %v1892_v20 = vmax.f32 %v1840_v40, 0.0  ;;  %v1648_v44 = vpop.f32.mrb[60].mxu0  ;;  %v2402_v39 = vpop.f32.mrb[92].mxu1  ;;  %v1954_v47 = vmul.f32 %v3034_v24, %v1889_v38  ;;  %v2012_v48 = vadd.f32 %v1953_v54, %v1952_v33 }
 0x261   : > { %v2436_v53 = vadd.f32 %v1648_v44, %v3011_v5  ;;  %v1650_v51 = vpop.f32.mrb[61].mxu0  ;;  %v2403_v26 = vpop.f32.mrb[93].mxu1 }
 0x262   : > { %v2437_v55 = vadd.f32 %v1650_v51, %v3020_v9  ;;  %v2404_v56 = vadd.f32 %v2403_v26, %v2402_v39  ;;  %v1652_v58 = vpop.f32.mrb[62].mxu0  ;;  %v2405_v59 = vpop.f32.mrb[94].mxu1  ;;  %v2013_v14 = vadd.f32 %v2012_v48, %v1954_v47  ;;  %v1957_v61 = vmul.f32 %v3034_v24, %v1892_v20 }
 0x263   : > { %v1893_v0 = vmax.f32 %v2436_v53, 0.0  ;;  %v2438_v2 = vadd.f32 %v1652_v58, %v3011_v5  ;;  %v1654_v13 = vpop.f32.mrb[63].mxu0  ;;  %v2406_v62 = vpop.f32.mrb[95].mxu1  ;;  %v2016_v1 = vadd.f32 %v1956_v43, %v1955_v41 }
 0x264   : > { %v1894_v32 = vmax.f32 %v2437_v55, 0.0  ;;  %v1845_v11 = vadd.f32 %v2404_v56, %v1748_v52  ;;  %v2439_v16 = vadd.f32 %v1654_v13, %v3020_v9  ;;  %v2407_v3 = vadd.f32 %v2406_v62, %v2405_v59  ;;  %2014 = vadd.xlane.f32.xlu0 %v2013_v14 }
 0x265   : > { %v1958_v17 = vmul.f32 %v3024_v18, %v1893_v0  ;;  %v1896_v19 = vmax.f32 %v2438_v2, 0.0  ;;  %v2017_v21 = vadd.f32 %v2016_v1, %v1957_v61 }
 0x266   : > { %v1959_v42 = vmul.f32 %v3029_v29, %v1894_v32  ;;  %v1895_v4 = vmax.f32 %v1845_v11, 0.0  ;;  %v1897_v6 = vmax.f32 %v2439_v16, 0.0  ;;  %v1848_v22 = vadd.f32 %v2407_v3, %v1751_v63 }
 0x267   : > { %v1961_v5 = vmul.f32 %v3024_v18, %v1896_v19  ;;  %2018 = vadd.xlane.f32.xlu1 %v2017_v21 }
 0x268   : > { %v1962_v23 = vmul.f32 %v3029_v29, %v1897_v6  ;;  %v1898_v31 = vmax.f32 %v1848_v22, 0.0  ;;  %v1960_v9 = vmul.f32 %v3034_v24, %v1895_v4  ;;  %v2020_v15 = vadd.f32 %v1959_v42, %v1958_v17 }
 0x26a   : > { %v2021_v49 = vadd.f32 %v2020_v15, %v1960_v9  ;;  %v1963_v28 = vmul.f32 %v3034_v24, %v1898_v31  ;;  %v2024_v35 = vadd.f32 %v1962_v23, %v1961_v5 }
 0x26c   : > { %2022 = vadd.xlane.f32.xlu0 %v2021_v49  ;;  %v2025_v50 = vadd.f32 %v2024_v35, %v1963_v28 }
 0x26e   : > { %2026 = vadd.xlane.f32.xlu1 %v2025_v50 }
 0x2c1   : > { %v1967_v18 = vpop.xlane.xlu0 %1966 }
 0x2c2   : > { %v2035_v29 = vadd.f32 %v2277_v8, %v1967_v18 }
 0x2c4   : > { %2052 = vst.msk [vmem:[%s3145_s25] sm:$0xff] %vm2051_vm2, %v2035_v29 }
 0x2c5   : > { %v1971_v24 = vpop.xlane.xlu0 %1970 }
 0x2c6   : > { %v2036_v45 = vadd.f32 %v2277_v8, %v1971_v24 }
 0x2c8   : > { %2053 = vst.msk [vmem:[%s3145_s25 + $0x8] sm:$0xff] %vm2051_vm2, %v2036_v45 }
 0x2c9   : > { %v1975_v46 = vpop.xlane.xlu1 %1974 }
 0x2ca   : > { %v2037_v10 = vadd.f32 %v2277_v8, %v1975_v46 }
 0x2cc   : > { %2054 = vst.msk [vmem:[%s3145_s25 + $0x10] sm:$0xff] %vm2051_vm2, %v2037_v10 }
 0x2cd   : > { %v1979_v25 = vpop.xlane.xlu1 %1978 }
 0x2ce   : > { %v2038_v57 = vadd.f32 %v2277_v8, %v1979_v25 }
 0x2d0   : > { %2055 = vst.msk [vmem:[%s3145_s25 + $0x18] sm:$0xff] %vm2051_vm2, %v2038_v57 }
 0x2d1   : > { %v1983_v7 = vpop.xlane.xlu0 %1982 }
 0x2d2   : > { %v2039_v27 = vadd.f32 %v2277_v8, %v1983_v7 }
 0x2d4   : > { %2056 = vst.msk [vmem:[%s3145_s25 + $0x20] sm:$0xff] %vm2051_vm2, %v2039_v27  ;;  %v1987_v30 = vpop.xlane.xlu1 %1986 }
 0x2d5   : > { %v2040_v12 = vadd.f32 %v2277_v8, %v1987_v30 }
 0x2d7   : > { %2057 = vst.msk [vmem:[%s3145_s25 + $0x28] sm:$0xff] %vm2051_vm2, %v2040_v12 }
 0x2d9   : > { %v1991_v36 = vpop.xlane.xlu0 %1990 }
 0x2da   : > { %v2041_v33 = vadd.f32 %v2277_v8, %v1991_v36 }
 0x2dc   : > { %2058 = vst.msk [vmem:[%s3145_s25 + $0x30] sm:$0xff] %vm2051_vm2, %v2041_v33  ;;  %v1995_v34 = vpop.xlane.xlu1 %1994 }
 0x2dd   : > { %v2042_v37 = vadd.f32 %v2277_v8, %v1995_v34 }
 0x2df   : > { %2059 = vst.msk [vmem:[%s3145_s25 + $0x38] sm:$0xff] %vm2051_vm2, %v2042_v37 }
 0x2e1   : > { %v1999_v54 = vpop.xlane.xlu0 %1998 }
 0x2e2   : > { %v2043_v38 = vadd.f32 %v2277_v8, %v1999_v54 }
 0x2e4   : > { %2060 = vst.msk [vmem:[%s3145_s25 + $0x40] sm:$0xff] %vm2051_vm2, %v2043_v38  ;;  %v2003_v60 = vpop.xlane.xlu1 %2002 }
 0x2e5   : > { %v2044_v40 = vadd.f32 %v2277_v8, %v2003_v60 }
 0x2e7   : > { %2061 = vst.msk [vmem:[%s3145_s25 + $0x48] sm:$0xff] %vm2051_vm2, %v2044_v40 }
 0x2e9   : > { %v2007_v41 = vpop.xlane.xlu0 %2006 }
 0x2ea   : > { %v2045_v43 = vadd.f32 %v2277_v8, %v2007_v41 }
 0x2ec   : > { %2062 = vst.msk [vmem:[%s3145_s25 + $0x50] sm:$0xff] %vm2051_vm2, %v2045_v43  ;;  %v2011_v20 = vpop.xlane.xlu1 %2010 }
 0x2ed   : > { %v2046_v44 = vadd.f32 %v2277_v8, %v2011_v20 }
 0x2ef   : > { %2063 = vst.msk [vmem:[%s3145_s25 + $0x58] sm:$0xff] %vm2051_vm2, %v2046_v44 }
 0x2f1   : > { %v2015_v39 = vpop.xlane.xlu0 %2014 }
 0x2f2   : > { %v2047_v47 = vadd.f32 %v2277_v8, %v2015_v39 }
 0x2f4   : > { %2064 = vst.msk [vmem:[%s3145_s25 + $0x60] sm:$0xff] %vm2051_vm2, %v2047_v47  ;;  %v2019_v48 = vpop.xlane.xlu1 %2018 }
 0x2f5   : > { %v2048_v52 = vadd.f32 %v2277_v8, %v2019_v48 }
 0x2f7   : > { %2065 = vst.msk [vmem:[%s3145_s25 + $0x68] sm:$0xff] %vm2051_vm2, %v2048_v52 }
 0x2f9   : > { %v2023_v53 = vpop.xlane.xlu0 %2022 }
 0x2fa   : > { %v2049_v51 = vadd.f32 %v2277_v8, %v2023_v53 }
 0x2fb   : > { %v2027_v26 = vpop.xlane.xlu1 %2026 }
 0x2fc   : > { %2066 = vst.msk [vmem:[%s3145_s25 + $0x70] sm:$0xff] %vm2051_vm2, %v2049_v51  ;;  %v2050_v55 = vadd.f32 %v2277_v8, %v2027_v26 }
 0x2fe   : > { %2067 = vst.msk [vmem:[%s3145_s25 + $0x78] sm:$0xff] %vm2051_vm2, %v2050_v55 }
 0x2ff PF: > { %s20_s26 = sadd.s32 1, %s2678_s26  }
 0x300   : > { %p17_p3 = scmp.ge.s32.totalorder %s20_s26, 4  }
 0x302   :  { %19 = sbr.rel (!%p17_p3) target bundleno = 4 (0x4), region = 83 }
 0x309   :  { %2090 = vsyncpa [#allocation4], 1 }
 0x30a   :  { %2092 = vsyncpa [#allocation4 + $0x1], 1 }

</bundles_post_ra>
